<compile_context>
chip_gen: v7x
topology: tpu7x:2x2x1
jax: 0.10.0
libtpu: 0.0.40
codegen_flags: <defaults>
</compile_context>

<pallas_src>
import functools

import numpy as np
import jax
import jax.numpy as jnp
from jax import lax
from jax.experimental import pallas as pl
from jax.experimental.pallas import tpu as pltpu


def _softmax_last(a):
    m = jnp.max(a, axis=-1, keepdims=True)
    e = jnp.exp(a - m)
    return e * pl.reciprocal(jnp.sum(e, axis=-1, keepdims=True), approx=True)


def _build_mix_selectors(N, C, H):
    """One-hot selectors reproducing torch's head-mixing reshapes as matmuls.

    channel:  (B,H,N,d) --row-major reshape--> (B,N,C)
              flat f = (h*N + n)*d + e -> (row, col) = divmod(f, C); the d values
              of one (h, n) stay in one row, in a d-aligned column block m.
    spatial:  (B,H,N,d) --permute(0,3,1,2)--> (B,d,H,N) --reshape--> (B,N,C)
              flat f = (e*H + h)*N + n -> (row, col) = divmod(f, C); the N values
              of one (h, e) stay in one row, in an N-aligned column block j
              (requires C % N == 0, asserted by the wrapper).
    """
    d = C // H
    sel_c = np.zeros((H, H, N, N), np.float32)        # [m, h, out_row, n]
    for h in range(H):
        for n in range(N):
            row, c0 = divmod((h * N + n) * d, C)
            sel_c[c0 // d, h, row, n] = 1.0
    sel_s = np.zeros((C // N, H, N, d), np.float32)   # [j, h, out_row, e]
    for h in range(H):
        for e in range(d):
            row, c0 = divmod((e * H + h) * N, C)
            sel_s[c0 // N, h, row, e] = 1.0
    return sel_c, sel_s


def _dca_fused_kernel(x_ref, qkw_ref, qkb_ref, vw_ref, vb_ref,
                      pkw_ref, pkb_ref, pvw_ref, pvb_ref, temp_ref,
                      selc_ref, sels_ref, w1_ref, w2_ref, pob_ref,
                      o_ref, mixc_scr, mixs_scr, *, num_heads):
    f32 = jnp.float32
    x = x_ref[0].astype(f32)                           # (N, C)
    N, C = x.shape
    H = num_heads
    d = C // H

    NN = (((2,), (1,)), ((0,), (0,)))   # batched matmul: (H,a,k) x (H,k,b) -> (H,a,b)
    NT = (((2,), (2,)), ((0,), (0,)))   # batched, rhs^T: (H,a,k) x (H,b,k) -> (H,a,b)

    # ---- projections: single full-token MXU matmuls, biases added once ----
    qk = jnp.dot(x, qkw_ref[...], preferred_element_type=f32) + qkb_ref[...]   # (N, 2C)
    vf = jnp.dot(x, vw_ref[...], preferred_element_type=f32) + vb_ref[...]     # (N, C)
    qkT = qk.T                                         # (2C, N)
    vfT = vf.T                                         # (C, N)

    # ---- head-stacked layouts (one slice+stack per tensor, then batched dots) ----
    q_hnd = jnp.stack([qk[:, h * d:(h + 1) * d] for h in range(H)], axis=0)          # (H,N,d)
    q_hdn = jnp.stack([qkT[h * d:(h + 1) * d, :] for h in range(H)], axis=0)         # (H,d,N)
    k_hdn = jnp.stack([qkT[C + h * d:C + (h + 1) * d, :] for h in range(H)], axis=0) # (H,d,N)
    v_hdn = jnp.stack([vfT[h * d:(h + 1) * d, :] for h in range(H)], axis=0)         # (H,d,N)

    temp = temp_ref[...]                               # (H, 1, 1)

    # ---- channel attention, all heads batched ----
    attn_c = lax.dot_general(q_hdn, k_hdn, NT, preferred_element_type=f32) * temp    # (H,d,d)
    attn_c = _softmax_last(attn_c)
    # TODO(synk): attn_drop (nn.Dropout) is implemented as identity (eval-mode semantics).
    ocT = lax.dot_general(attn_c, v_hdn, NN, preferred_element_type=f32)             # (H,d,N)

    # ---- spatial attention, all heads batched ----
    pkw_b = jnp.broadcast_to(pkw_ref[...], (H,) + pkw_ref.shape)                     # (H,N,P)
    pvw_b = jnp.broadcast_to(pvw_ref[...], (H,) + pvw_ref.shape)
    k_sp = lax.dot_general(k_hdn, pkw_b, NN, preferred_element_type=f32) + pkb_ref[...]   # (H,d,P)
    v_sp = lax.dot_general(v_hdn, pvw_b, NN, preferred_element_type=f32) + pvb_ref[...]   # (H,d,P)
    attn_s = lax.dot_general(q_hnd, k_sp, NN, preferred_element_type=f32) * temp          # (H,N,P)
    attn_s = _softmax_last(attn_s)
    osT = lax.dot_general(v_sp, attn_s, NT, preferred_element_type=f32)                   # (H,d,N)

    # ---- head mixing on-chip (torch's reshape / permute+reshape), via one-hot
    #      selector matmuls accumulated into VMEM scratch (bit-exact permutation) ----
    for m in range(H):
        z = lax.dot_general(selc_ref[m], ocT, NT, preferred_element_type=f32)   # (H, N, d)
        blk = z[0]
        for h in range(1, H):
            blk = blk + z[h]
        mixc_scr[:, m * d:(m + 1) * d] = blk
    for j in range(C // N):
        z = lax.dot_general(sels_ref[j], osT, NN, preferred_element_type=f32)   # (H, N, N)
        blk = z[0]
        for h in range(1, H):
            blk = blk + z[h]
        mixs_scr[:, j * N:(j + 1) * N] = blk

    # ---- residual + proj_out: concat([a, c]) @ Wo^T == a @ W1 + c @ W2 ----
    a = mixc_scr[...] + x
    c = mixs_scr[...] + x
    out = (jnp.dot(a, w1_ref[...], preferred_element_type=f32)
           + jnp.dot(c, w2_ref[...], preferred_element_type=f32)
           + pob_ref[...])
    o_ref[0] = out.astype(o_ref.dtype)                 # single lane-dense (N, C) store


def dca_forward(x, params, num_heads):
    B, N, C = x.shape
    H = num_heads
    assert C % H == 0, "hidden_size must be divisible by num_heads"
    d = C // H
    # TODO(synk): the fused on-chip spatial head-mix assumes hidden_size % input_size == 0;
    # other shapes would need a host-side permute fallback.
    assert C % N == 0, "fused kernel requires hidden_size % input_size == 0"
    P = params["pk_w"].shape[0]

    f32 = jnp.float32
    qk_wt = params["qk_w"].T.astype(f32)            # (C, 2C)
    qk_b = params["qk_b"].astype(f32)[None, :]      # (1, 2C)
    v_wt = params["v_w"].T.astype(f32)              # (C, C)
    v_b = params["v_b"].astype(f32)[None, :]        # (1, C)
    pk_wt = params["pk_w"].T.astype(f32)            # (N, P)
    pk_b = params["pk_b"].astype(f32)[None, :]      # (1, P)
    pv_wt = params["pv_w"].T.astype(f32)            # (N, P)
    pv_b = params["pv_b"].astype(f32)[None, :]      # (1, P)
    po_wt = params["po_w"].T.astype(f32)            # (2C, C)
    w1, w2 = po_wt[:C], po_wt[C:]                   # rows matching out_channel / out_spatial
    po_b = params["po_b"].astype(f32)[None, :]      # (1, C)
    temp = params["temperature"].astype(f32).reshape(H, 1, 1)

    sel_c, sel_s = _build_mix_selectors(N, C, H)

    def full(shape):
        zeros = (0,) * len(shape)
        return pl.BlockSpec(shape, lambda b: zeros)

    row_spec = pl.BlockSpec((1, N, C), lambda b: (b, 0, 0))

    kernel = functools.partial(_dca_fused_kernel, num_heads=H)
    return pl.pallas_call(
        kernel,
        grid=(B,),
        in_specs=[
            row_spec,                                   # x
            full((C, 2 * C)), full((1, 2 * C)),         # qk linear
            full((C, C)), full((1, C)),                 # v linear
            full((N, P)), full((1, P)),                 # proj_k_spatial
            full((N, P)), full((1, P)),                 # proj_v_spatial
            full((H, 1, 1)),                            # temperature
            full((H, H, N, N)),                         # channel-mix selectors
            full((C // N, H, N, d)),                    # spatial-mix selectors
            full((C, C)), full((C, C)), full((1, C)),   # proj_out (split) + bias
        ],
        out_specs=row_spec,
        out_shape=jax.ShapeDtypeStruct((B, N, C), x.dtype),
        scratch_shapes=[pltpu.VMEM((N, C), f32), pltpu.VMEM((N, C), f32)],
        compiler_params=pltpu.CompilerParams(
            dimension_semantics=("parallel",),
            vmem_limit_bytes=32 * 1024 * 1024),
    )(x, qk_wt, qk_b, v_wt, v_b, pk_wt, pk_b, pv_wt, pv_b, temp,
      jnp.asarray(sel_c), jnp.asarray(sel_s), w1, w2, po_b)


def dca_reference(x, params, num_heads):
    """Pure-JAX mirror of the PyTorch module (ground truth for the self-check)."""
    B, N, C = x.shape
    H = num_heads
    d = C // H
    qk = x @ params["qk_w"].T + params["qk_b"]
    qk = qk.reshape(B, N, 2, H, d).transpose(2, 0, 3, 1, 4)
    q, k = qk[0], qk[1]                                        # (B,H,N,d)
    v = (x @ params["v_w"].T + params["v_b"]).reshape(B, N, H, d).transpose(0, 2, 1, 3)
    q = jnp.swapaxes(q, -2, -1)                                # (B,H,d,N)
    v = jnp.swapaxes(v, -2, -1)                                # (B,H,d,N)
    t = params["temperature"]                                  # (H,1,1)
    attn_c = jax.nn.softmax((q @ k) * t, axis=-1)              # (B,H,d,d)
    out_channel = jnp.swapaxes(attn_c @ v, -2, -1).reshape(B, N, C) + x
    kT = jnp.swapaxes(k, -2, -1)                               # (B,H,d,N)
    k_sp = kT @ params["pk_w"].T + params["pk_b"]              # (B,H,d,P)
    v_sp = v @ params["pv_w"].T + params["pv_b"]               # (B,H,d,P)
    attn_s = jax.nn.softmax((jnp.swapaxes(q, -2, -1) @ k_sp) * t, axis=-1)
    out_spatial = (attn_s @ jnp.swapaxes(v_sp, -2, -1)).transpose(0, 3, 1, 2).reshape(B, N, C) + x
    return jnp.concatenate([out_channel, out_spatial], axis=-1) @ params["po_w"].T + params["po_b"]


def init_params(key, input_size, hidden_size, proj_size, num_heads):
    ks = jax.random.split(key, 10)

    def lin(kw, kb, out_f, in_f):
        w = jax.random.normal(kw, (out_f, in_f), jnp.float32) * 0.02
        b = jax.random.normal(kb, (out_f,), jnp.float32) * 0.02
        return w, b

    qk_w, qk_b = lin(ks[0], ks[1], hidden_size * 2, hidden_size)
    v_w, v_b = lin(ks[2], ks[3], hidden_size, hidden_size)
    pk_w, pk_b = lin(ks[4], ks[5], proj_size, input_size)
    pv_w, pv_b = lin(ks[6], ks[7], proj_size, input_size)
    po_w, po_b = lin(ks[8], ks[9], hidden_size, hidden_size * 2)
    temperature = jnp.ones((num_heads, 1, 1), jnp.float32)     # nn.Parameter(torch.ones(H,1,1))
    return dict(qk_w=qk_w, qk_b=qk_b, v_w=v_w, v_b=v_b,
                pk_w=pk_w, pk_b=pk_b, pv_w=pv_w, pv_b=pv_b,
                po_w=po_w, po_b=po_b, temperature=temperature)


if __name__ == "__main__":
    B, N, C, P, H = 2, 16, 32, 8, 4   # batch, input_size (tokens), hidden_size, proj_size, heads
    key = jax.random.PRNGKey(0)
    kx, kp = jax.random.split(key)
    x = jax.random.normal(kx, (B, N, C), jnp.float32)
    params = init_params(kp, input_size=N, hidden_size=C, proj_size=P, num_heads=H)

    fwd = jax.jit(functools.partial(dca_forward, num_heads=H))
    out = fwd(x, params)
    jax.block_until_ready(out)
    assert out.shape == (B, N, C) and out.dtype == jnp.float32

    ref = dca_reference(x, params, H)
    err = float(jnp.max(jnp.abs(out - ref)))
    assert err < 2e-3, f"kernel/reference mismatch, max abs err = {err}"
    print("KERNEL_OK")
</pallas_src>

<mosaic_0001>
module attributes {stable_mosaic.version = 11 : i64} {
  func.func @_dca_fused_kernel(%arg0: i32, %arg1: memref<1x16x32xf32, #tpu.memory_space<vmem>>, %arg2: memref<32x64xf32, #tpu.memory_space<vmem>>, %arg3: memref<1x64xf32, #tpu.memory_space<vmem>>, %arg4: memref<32x32xf32, #tpu.memory_space<vmem>>, %arg5: memref<1x32xf32, #tpu.memory_space<vmem>>, %arg6: memref<16x8xf32, #tpu.memory_space<vmem>>, %arg7: memref<1x8xf32, #tpu.memory_space<vmem>>, %arg8: memref<16x8xf32, #tpu.memory_space<vmem>>, %arg9: memref<1x8xf32, #tpu.memory_space<vmem>>, %arg10: memref<4x1x1xf32, #tpu.memory_space<vmem>>, %arg11: memref<4x4x16x16xf32, #tpu.memory_space<vmem>>, %arg12: memref<2x4x16x8xf32, #tpu.memory_space<vmem>>, %arg13: memref<32x32xf32, #tpu.memory_space<vmem>>, %arg14: memref<32x32xf32, #tpu.memory_space<vmem>>, %arg15: memref<1x32xf32, #tpu.memory_space<vmem>>, %arg16: memref<1x16x32xf32, #tpu.memory_space<vmem>>, %arg17: memref<16x32xf32, #tpu.memory_space<vmem>>, %arg18: memref<16x32xf32, #tpu.memory_space<vmem>>) attributes {dimension_semantics = [#tpu.dimension_semantics<parallel>], iteration_bounds = array<i64: 2>, scalar_prefetch = 0 : i64, scratch_operands = 2 : i64, tpu.core_type = #tpu.core_type<tc>, window_params = [{transform_indices = @transform_0, window_bounds = array<i64: 1, 16, 32>}, {pipeline_mode = #tpu.pipeline_mode<synchronous>, transform_indices = @transform_1, window_bounds = array<i64: 32, 64>}, {pipeline_mode = #tpu.pipeline_mode<synchronous>, transform_indices = @transform_2, window_bounds = array<i64: 1, 64>}, {pipeline_mode = #tpu.pipeline_mode<synchronous>, transform_indices = @transform_3, window_bounds = array<i64: 32, 32>}, {pipeline_mode = #tpu.pipeline_mode<synchronous>, transform_indices = @transform_4, window_bounds = array<i64: 1, 32>}, {pipeline_mode = #tpu.pipeline_mode<synchronous>, transform_indices = @transform_5, window_bounds = array<i64: 16, 8>}, {pipeline_mode = #tpu.pipeline_mode<synchronous>, transform_indices = @transform_6, window_bounds = array<i64: 1, 8>}, {pipeline_mode = #tpu.pipeline_mode<synchronous>, transform_indices = @transform_7, window_bounds = array<i64: 16, 8>}, {pipeline_mode = #tpu.pipeline_mode<synchronous>, transform_indices = @transform_8, window_bounds = array<i64: 1, 8>}, {pipeline_mode = #tpu.pipeline_mode<synchronous>, transform_indices = @transform_9, window_bounds = array<i64: 4, 1, 1>}, {pipeline_mode = #tpu.pipeline_mode<synchronous>, transform_indices = @transform_10, window_bounds = array<i64: 4, 4, 16, 16>}, {pipeline_mode = #tpu.pipeline_mode<synchronous>, transform_indices = @transform_11, window_bounds = array<i64: 2, 4, 16, 8>}, {pipeline_mode = #tpu.pipeline_mode<synchronous>, transform_indices = @transform_12, window_bounds = array<i64: 32, 32>}, {pipeline_mode = #tpu.pipeline_mode<synchronous>, transform_indices = @transform_13, window_bounds = array<i64: 32, 32>}, {pipeline_mode = #tpu.pipeline_mode<synchronous>, transform_indices = @transform_14, window_bounds = array<i64: 1, 32>}, {transform_indices = @transform_15, window_bounds = array<i64: 1, 16, 32>}]} {
    %c0 = arith.constant 0 : index
    %c0_0 = arith.constant 0 : index
    %c0_1 = arith.constant 0 : index
    %0 = vector.load %arg1[%c0, %c0_0, %c0_1] : memref<1x16x32xf32, #tpu.memory_space<vmem>>, vector<1x16x32xf32>
    %1 = vector.shape_cast %0 : vector<1x16x32xf32> to vector<16x32xf32>
    %c0_2 = arith.constant 0 : index
    %c0_3 = arith.constant 0 : index
    %2 = vector.load %arg2[%c0_2, %c0_3] : memref<32x64xf32, #tpu.memory_space<vmem>>, vector<32x64xf32>
    %cst = arith.constant dense<0.000000e+00> : vector<16x64xf32>
    %3 = tpu.matmul %1, %2, %cst {dimension_numbers = #tpu.dot_dimension_numbers<[1], [0], [0], [1], [0, 0, 1, 1], [], []>} : vector<16x32xf32>, vector<32x64xf32>, vector<16x64xf32> -> vector<16x64xf32>
    %c0_4 = arith.constant 0 : index
    %c0_5 = arith.constant 0 : index
    %4 = vector.load %arg3[%c0_4, %c0_5] : memref<1x64xf32, #tpu.memory_space<vmem>>, vector<1x64xf32>
    %5 = vector.broadcast %4 : vector<1x64xf32> to vector<16x64xf32>
    %6 = arith.addf %3, %5 : vector<16x64xf32>
    %c0_6 = arith.constant 0 : index
    %c0_7 = arith.constant 0 : index
    %7 = vector.load %arg4[%c0_6, %c0_7] : memref<32x32xf32, #tpu.memory_space<vmem>>, vector<32x32xf32>
    %cst_8 = arith.constant dense<0.000000e+00> : vector<16x32xf32>
    %8 = tpu.matmul %1, %7, %cst_8 {dimension_numbers = #tpu.dot_dimension_numbers<[1], [0], [0], [1], [0, 0, 1, 1], [], []>} : vector<16x32xf32>, vector<32x32xf32>, vector<16x32xf32> -> vector<16x32xf32>
    %c0_9 = arith.constant 0 : index
    %c0_10 = arith.constant 0 : index
    %9 = vector.load %arg5[%c0_9, %c0_10] : memref<1x32xf32, #tpu.memory_space<vmem>>, vector<1x32xf32>
    %10 = vector.broadcast %9 : vector<1x32xf32> to vector<16x32xf32>
    %11 = arith.addf %8, %10 : vector<16x32xf32>
    %12 = tpu.transpose %6, [1, 0] : vector<16x64xf32> -> vector<64x16xf32>
    %13 = tpu.transpose %11, [1, 0] : vector<16x32xf32> -> vector<32x16xf32>
    %14 = vector.extract_strided_slice %6 {offsets = [0, 0], sizes = [16, 8], strides = [1, 1]} : vector<16x64xf32> to vector<16x8xf32>
    %15 = vector.extract_strided_slice %6 {offsets = [0, 8], sizes = [16, 8], strides = [1, 1]} : vector<16x64xf32> to vector<16x8xf32>
    %16 = vector.extract_strided_slice %6 {offsets = [0, 16], sizes = [16, 8], strides = [1, 1]} : vector<16x64xf32> to vector<16x8xf32>
    %17 = vector.extract_strided_slice %6 {offsets = [0, 24], sizes = [16, 8], strides = [1, 1]} : vector<16x64xf32> to vector<16x8xf32>
    %18 = vector.shape_cast %14 : vector<16x8xf32> to vector<1x16x8xf32>
    %19 = vector.shape_cast %15 : vector<16x8xf32> to vector<1x16x8xf32>
    %20 = vector.shape_cast %16 : vector<16x8xf32> to vector<1x16x8xf32>
    %21 = vector.shape_cast %17 : vector<16x8xf32> to vector<1x16x8xf32>
    %22 = tpu.concatenate %18, %19, %20, %21 in 0 : vector<1x16x8xf32>, vector<1x16x8xf32>, vector<1x16x8xf32>, vector<1x16x8xf32> -> vector<4x16x8xf32>
    %23 = vector.extract_strided_slice %12 {offsets = [0, 0], sizes = [8, 16], strides = [1, 1]} : vector<64x16xf32> to vector<8x16xf32>
    %24 = vector.extract_strided_slice %12 {offsets = [8, 0], sizes = [8, 16], strides = [1, 1]} : vector<64x16xf32> to vector<8x16xf32>
    %25 = vector.extract_strided_slice %12 {offsets = [16, 0], sizes = [8, 16], strides = [1, 1]} : vector<64x16xf32> to vector<8x16xf32>
    %26 = vector.extract_strided_slice %12 {offsets = [24, 0], sizes = [8, 16], strides = [1, 1]} : vector<64x16xf32> to vector<8x16xf32>
    %27 = vector.shape_cast %23 : vector<8x16xf32> to vector<1x8x16xf32>
    %28 = vector.shape_cast %24 : vector<8x16xf32> to vector<1x8x16xf32>
    %29 = vector.shape_cast %25 : vector<8x16xf32> to vector<1x8x16xf32>
    %30 = vector.shape_cast %26 : vector<8x16xf32> to vector<1x8x16xf32>
    %31 = tpu.concatenate %27, %28, %29, %30 in 0 : vector<1x8x16xf32>, vector<1x8x16xf32>, vector<1x8x16xf32>, vector<1x8x16xf32> -> vector<4x8x16xf32>
    %32 = vector.extract_strided_slice %12 {offsets = [32, 0], sizes = [8, 16], strides = [1, 1]} : vector<64x16xf32> to vector<8x16xf32>
    %33 = vector.extract_strided_slice %12 {offsets = [40, 0], sizes = [8, 16], strides = [1, 1]} : vector<64x16xf32> to vector<8x16xf32>
    %34 = vector.extract_strided_slice %12 {offsets = [48, 0], sizes = [8, 16], strides = [1, 1]} : vector<64x16xf32> to vector<8x16xf32>
    %35 = vector.extract_strided_slice %12 {offsets = [56, 0], sizes = [8, 16], strides = [1, 1]} : vector<64x16xf32> to vector<8x16xf32>
    %36 = vector.shape_cast %32 : vector<8x16xf32> to vector<1x8x16xf32>
    %37 = vector.shape_cast %33 : vector<8x16xf32> to vector<1x8x16xf32>
    %38 = vector.shape_cast %34 : vector<8x16xf32> to vector<1x8x16xf32>
    %39 = vector.shape_cast %35 : vector<8x16xf32> to vector<1x8x16xf32>
    %40 = tpu.concatenate %36, %37, %38, %39 in 0 : vector<1x8x16xf32>, vector<1x8x16xf32>, vector<1x8x16xf32>, vector<1x8x16xf32> -> vector<4x8x16xf32>
    %41 = vector.extract_strided_slice %13 {offsets = [0, 0], sizes = [8, 16], strides = [1, 1]} : vector<32x16xf32> to vector<8x16xf32>
    %42 = vector.extract_strided_slice %13 {offsets = [8, 0], sizes = [8, 16], strides = [1, 1]} : vector<32x16xf32> to vector<8x16xf32>
    %43 = vector.extract_strided_slice %13 {offsets = [16, 0], sizes = [8, 16], strides = [1, 1]} : vector<32x16xf32> to vector<8x16xf32>
    %44 = vector.extract_strided_slice %13 {offsets = [24, 0], sizes = [8, 16], strides = [1, 1]} : vector<32x16xf32> to vector<8x16xf32>
    %45 = vector.shape_cast %41 : vector<8x16xf32> to vector<1x8x16xf32>
    %46 = vector.shape_cast %42 : vector<8x16xf32> to vector<1x8x16xf32>
    %47 = vector.shape_cast %43 : vector<8x16xf32> to vector<1x8x16xf32>
    %48 = vector.shape_cast %44 : vector<8x16xf32> to vector<1x8x16xf32>
    %49 = tpu.concatenate %45, %46, %47, %48 in 0 : vector<1x8x16xf32>, vector<1x8x16xf32>, vector<1x8x16xf32>, vector<1x8x16xf32> -> vector<4x8x16xf32>
    %c0_11 = arith.constant 0 : index
    %c0_12 = arith.constant 0 : index
    %c0_13 = arith.constant 0 : index
    %50 = vector.load %arg10[%c0_11, %c0_12, %c0_13] : memref<4x1x1xf32, #tpu.memory_space<vmem>>, vector<4x1x1xf32>
    %cst_14 = arith.constant dense<0.000000e+00> : vector<4x8x8xf32>
    %51 = tpu.matmul %31, %40, %cst_14 {dimension_numbers = #tpu.dot_dimension_numbers<[2], [2], [1], [1], [0, 0, 0, 1, 1, 1], [0], [0]>} : vector<4x8x16xf32>, vector<4x8x16xf32>, vector<4x8x8xf32> -> vector<4x8x8xf32>
    %52 = vector.broadcast %50 : vector<4x1x1xf32> to vector<4x8x8xf32>
    %53 = arith.mulf %51, %52 : vector<4x8x8xf32>
    %cst_15 = arith.constant dense<0xFF800000> : vector<4x8xf32>
    %54 = vector.multi_reduction <maximumf>, %53, %cst_15 [2] : vector<4x8x8xf32> to vector<4x8xf32>
    %55 = vector.shape_cast %54 : vector<4x8xf32> to vector<4x8x1xf32>
    %56 = vector.broadcast %55 : vector<4x8x1xf32> to vector<4x8x8xf32>
    %57 = arith.subf %53, %56 : vector<4x8x8xf32>
    %58 = math.exp %57 : vector<4x8x8xf32>
    %cst_16 = arith.constant dense<0.000000e+00> : vector<4x8xf32>
    %59 = vector.multi_reduction <add>, %58, %cst_16 [2] : vector<4x8x8xf32> to vector<4x8xf32>
    %60 = vector.shape_cast %59 : vector<4x8xf32> to vector<4x8x1xf32>
    %61 = tpu.reciprocal %60 {approx = true} : vector<4x8x1xf32> -> vector<4x8x1xf32>
    %62 = vector.broadcast %61 : vector<4x8x1xf32> to vector<4x8x8xf32>
    %63 = arith.mulf %58, %62 : vector<4x8x8xf32>
    %cst_17 = arith.constant dense<0.000000e+00> : vector<4x8x16xf32>
    %64 = tpu.matmul %63, %49, %cst_17 {dimension_numbers = #tpu.dot_dimension_numbers<[2], [1], [1], [2], [0, 0, 0, 1, 1, 2], [0], [0]>} : vector<4x8x8xf32>, vector<4x8x16xf32>, vector<4x8x16xf32> -> vector<4x8x16xf32>
    %c0_18 = arith.constant 0 : index
    %c0_19 = arith.constant 0 : index
    %65 = vector.load %arg6[%c0_18, %c0_19] : memref<16x8xf32, #tpu.memory_space<vmem>>, vector<16x8xf32>
    %66 = vector.shape_cast %65 : vector<16x8xf32> to vector<1x16x8xf32>
    %67 = vector.broadcast %66 : vector<1x16x8xf32> to vector<4x16x8xf32>
    %c0_20 = arith.constant 0 : index
    %c0_21 = arith.constant 0 : index
    %68 = vector.load %arg8[%c0_20, %c0_21] : memref<16x8xf32, #tpu.memory_space<vmem>>, vector<16x8xf32>
    %69 = vector.shape_cast %68 : vector<16x8xf32> to vector<1x16x8xf32>
    %70 = vector.broadcast %69 : vector<1x16x8xf32> to vector<4x16x8xf32>
    %cst_22 = arith.constant dense<0.000000e+00> : vector<4x8x8xf32>
    %71 = tpu.matmul %40, %67, %cst_22 {dimension_numbers = #tpu.dot_dimension_numbers<[2], [1], [1], [2], [0, 0, 0, 1, 1, 2], [0], [0]>} : vector<4x8x16xf32>, vector<4x16x8xf32>, vector<4x8x8xf32> -> vector<4x8x8xf32>
    %c0_23 = arith.constant 0 : index
    %c0_24 = arith.constant 0 : index
    %72 = vector.load %arg7[%c0_23, %c0_24] : memref<1x8xf32, #tpu.memory_space<vmem>>, vector<1x8xf32>
    %73 = vector.shape_cast %72 : vector<1x8xf32> to vector<1x1x8xf32>
    %74 = vector.broadcast %73 : vector<1x1x8xf32> to vector<4x8x8xf32>
    %75 = arith.addf %71, %74 : vector<4x8x8xf32>
    %cst_25 = arith.constant dense<0.000000e+00> : vector<4x8x8xf32>
    %76 = tpu.matmul %49, %70, %cst_25 {dimension_numbers = #tpu.dot_dimension_numbers<[2], [1], [1], [2], [0, 0, 0, 1, 1, 2], [0], [0]>} : vector<4x8x16xf32>, vector<4x16x8xf32>, vector<4x8x8xf32> -> vector<4x8x8xf32>
    %c0_26 = arith.constant 0 : index
    %c0_27 = arith.constant 0 : index
    %77 = vector.load %arg9[%c0_26, %c0_27] : memref<1x8xf32, #tpu.memory_space<vmem>>, vector<1x8xf32>
    %78 = vector.shape_cast %77 : vector<1x8xf32> to vector<1x1x8xf32>
    %79 = vector.broadcast %78 : vector<1x1x8xf32> to vector<4x8x8xf32>
    %80 = arith.addf %76, %79 : vector<4x8x8xf32>
    %cst_28 = arith.constant dense<0.000000e+00> : vector<4x16x8xf32>
    %81 = tpu.matmul %22, %75, %cst_28 {dimension_numbers = #tpu.dot_dimension_numbers<[2], [1], [1], [2], [0, 0, 0, 1, 1, 2], [0], [0]>} : vector<4x16x8xf32>, vector<4x8x8xf32>, vector<4x16x8xf32> -> vector<4x16x8xf32>
    %82 = vector.broadcast %50 : vector<4x1x1xf32> to vector<4x16x8xf32>
    %83 = arith.mulf %81, %82 : vector<4x16x8xf32>
    %cst_29 = arith.constant dense<0xFF800000> : vector<4x16xf32>
    %84 = vector.multi_reduction <maximumf>, %83, %cst_29 [2] : vector<4x16x8xf32> to vector<4x16xf32>
    %85 = vector.shape_cast %84 : vector<4x16xf32> to vector<4x16x1xf32>
    %86 = vector.broadcast %85 : vector<4x16x1xf32> to vector<4x16x8xf32>
    %87 = arith.subf %83, %86 : vector<4x16x8xf32>
    %88 = math.exp %87 : vector<4x16x8xf32>
    %cst_30 = arith.constant dense<0.000000e+00> : vector<4x16xf32>
    %89 = vector.multi_reduction <add>, %88, %cst_30 [2] : vector<4x16x8xf32> to vector<4x16xf32>
    %90 = vector.shape_cast %89 : vector<4x16xf32> to vector<4x16x1xf32>
    %91 = tpu.reciprocal %90 {approx = true} : vector<4x16x1xf32> -> vector<4x16x1xf32>
    %92 = vector.broadcast %91 : vector<4x16x1xf32> to vector<4x16x8xf32>
    %93 = arith.mulf %88, %92 : vector<4x16x8xf32>
    %cst_31 = arith.constant dense<0.000000e+00> : vector<4x8x16xf32>
    %94 = tpu.matmul %80, %93, %cst_31 {dimension_numbers = #tpu.dot_dimension_numbers<[2], [2], [1], [1], [0, 0, 0, 1, 1, 1], [0], [0]>} : vector<4x8x8xf32>, vector<4x16x8xf32>, vector<4x8x16xf32> -> vector<4x8x16xf32>
    %c0_32 = arith.constant 0 : index
    %c0_33 = arith.constant 0 : index
    %c0_34 = arith.constant 0 : index
    %c0_35 = arith.constant 0 : index
    %95 = vector.load %arg11[%c0_32, %c0_33, %c0_34, %c0_35] : memref<4x4x16x16xf32, #tpu.memory_space<vmem>>, vector<1x4x16x16xf32>
    %96 = vector.shape_cast %95 : vector<1x4x16x16xf32> to vector<4x16x16xf32>
    %cst_36 = arith.constant dense<0.000000e+00> : vector<4x16x8xf32>
    %97 = tpu.matmul %96, %64, %cst_36 {dimension_numbers = #tpu.dot_dimension_numbers<[2], [2], [1], [1], [0, 0, 0, 1, 1, 1], [0], [0]>} : vector<4x16x16xf32>, vector<4x8x16xf32>, vector<4x16x8xf32> -> vector<4x16x8xf32>
    %98 = vector.extract_strided_slice %97 {offsets = [0, 0, 0], sizes = [1, 16, 8], strides = [1, 1, 1]} : vector<4x16x8xf32> to vector<1x16x8xf32>
    %99 = vector.shape_cast %98 : vector<1x16x8xf32> to vector<16x8xf32>
    %100 = vector.extract_strided_slice %97 {offsets = [1, 0, 0], sizes = [1, 16, 8], strides = [1, 1, 1]} : vector<4x16x8xf32> to vector<1x16x8xf32>
    %101 = vector.shape_cast %100 : vector<1x16x8xf32> to vector<16x8xf32>
    %102 = arith.addf %99, %101 : vector<16x8xf32>
    %103 = vector.extract_strided_slice %97 {offsets = [2, 0, 0], sizes = [1, 16, 8], strides = [1, 1, 1]} : vector<4x16x8xf32> to vector<1x16x8xf32>
    %104 = vector.shape_cast %103 : vector<1x16x8xf32> to vector<16x8xf32>
    %105 = arith.addf %102, %104 : vector<16x8xf32>
    %106 = vector.extract_strided_slice %97 {offsets = [3, 0, 0], sizes = [1, 16, 8], strides = [1, 1, 1]} : vector<4x16x8xf32> to vector<1x16x8xf32>
    %107 = vector.shape_cast %106 : vector<1x16x8xf32> to vector<16x8xf32>
    %108 = arith.addf %105, %107 : vector<16x8xf32>
    %c0_37 = arith.constant 0 : index
    %c0_38 = arith.constant 0 : index
    %109 = vector.load %arg17[%c0_37, %c0_38] : memref<16x32xf32, #tpu.memory_space<vmem>>, vector<16x8xf32>
    tpu.vector_store %arg17[%c0_37, %c0_38], %108 {strides = array<i32>} : memref<16x32xf32, #tpu.memory_space<vmem>>, vector<16x8xf32>,
    %c1 = arith.constant 1 : index
    %c0_39 = arith.constant 0 : index
    %c0_40 = arith.constant 0 : index
    %c0_41 = arith.constant 0 : index
    %110 = vector.load %arg11[%c1, %c0_39, %c0_40, %c0_41] : memref<4x4x16x16xf32, #tpu.memory_space<vmem>>, vector<1x4x16x16xf32>
    %111 = vector.shape_cast %110 : vector<1x4x16x16xf32> to vector<4x16x16xf32>
    %cst_42 = arith.constant dense<0.000000e+00> : vector<4x16x8xf32>
    %112 = tpu.matmul %111, %64, %cst_42 {dimension_numbers = #tpu.dot_dimension_numbers<[2], [2], [1], [1], [0, 0, 0, 1, 1, 1], [0], [0]>} : vector<4x16x16xf32>, vector<4x8x16xf32>, vector<4x16x8xf32> -> vector<4x16x8xf32>
    %113 = vector.extract_strided_slice %112 {offsets = [0, 0, 0], sizes = [1, 16, 8], strides = [1, 1, 1]} : vector<4x16x8xf32> to vector<1x16x8xf32>
    %114 = vector.shape_cast %113 : vector<1x16x8xf32> to vector<16x8xf32>
    %115 = vector.extract_strided_slice %112 {offsets = [1, 0, 0], sizes = [1, 16, 8], strides = [1, 1, 1]} : vector<4x16x8xf32> to vector<1x16x8xf32>
    %116 = vector.shape_cast %115 : vector<1x16x8xf32> to vector<16x8xf32>
    %117 = arith.addf %114, %116 : vector<16x8xf32>
    %118 = vector.extract_strided_slice %112 {offsets = [2, 0, 0], sizes = [1, 16, 8], strides = [1, 1, 1]} : vector<4x16x8xf32> to vector<1x16x8xf32>
    %119 = vector.shape_cast %118 : vector<1x16x8xf32> to vector<16x8xf32>
    %120 = arith.addf %117, %119 : vector<16x8xf32>
    %121 = vector.extract_strided_slice %112 {offsets = [3, 0, 0], sizes = [1, 16, 8], strides = [1, 1, 1]} : vector<4x16x8xf32> to vector<1x16x8xf32>
    %122 = vector.shape_cast %121 : vector<1x16x8xf32> to vector<16x8xf32>
    %123 = arith.addf %120, %122 : vector<16x8xf32>
    %c0_43 = arith.constant 0 : index
    %c8 = arith.constant 8 : index
    %124 = vector.load %arg17[%c0_43, %c8] : memref<16x32xf32, #tpu.memory_space<vmem>>, vector<16x8xf32>
    tpu.vector_store %arg17[%c0_43, %c8], %123 {strides = array<i32>} : memref<16x32xf32, #tpu.memory_space<vmem>>, vector<16x8xf32>,
    %c2 = arith.constant 2 : index
    %c0_44 = arith.constant 0 : index
    %c0_45 = arith.constant 0 : index
    %c0_46 = arith.constant 0 : index
    %125 = vector.load %arg11[%c2, %c0_44, %c0_45, %c0_46] : memref<4x4x16x16xf32, #tpu.memory_space<vmem>>, vector<1x4x16x16xf32>
    %126 = vector.shape_cast %125 : vector<1x4x16x16xf32> to vector<4x16x16xf32>
    %cst_47 = arith.constant dense<0.000000e+00> : vector<4x16x8xf32>
    %127 = tpu.matmul %126, %64, %cst_47 {dimension_numbers = #tpu.dot_dimension_numbers<[2], [2], [1], [1], [0, 0, 0, 1, 1, 1], [0], [0]>} : vector<4x16x16xf32>, vector<4x8x16xf32>, vector<4x16x8xf32> -> vector<4x16x8xf32>
    %128 = vector.extract_strided_slice %127 {offsets = [0, 0, 0], sizes = [1, 16, 8], strides = [1, 1, 1]} : vector<4x16x8xf32> to vector<1x16x8xf32>
    %129 = vector.shape_cast %128 : vector<1x16x8xf32> to vector<16x8xf32>
    %130 = vector.extract_strided_slice %127 {offsets = [1, 0, 0], sizes = [1, 16, 8], strides = [1, 1, 1]} : vector<4x16x8xf32> to vector<1x16x8xf32>
    %131 = vector.shape_cast %130 : vector<1x16x8xf32> to vector<16x8xf32>
    %132 = arith.addf %129, %131 : vector<16x8xf32>
    %133 = vector.extract_strided_slice %127 {offsets = [2, 0, 0], sizes = [1, 16, 8], strides = [1, 1, 1]} : vector<4x16x8xf32> to vector<1x16x8xf32>
    %134 = vector.shape_cast %133 : vector<1x16x8xf32> to vector<16x8xf32>
    %135 = arith.addf %132, %134 : vector<16x8xf32>
    %136 = vector.extract_strided_slice %127 {offsets = [3, 0, 0], sizes = [1, 16, 8], strides = [1, 1, 1]} : vector<4x16x8xf32> to vector<1x16x8xf32>
    %137 = vector.shape_cast %136 : vector<1x16x8xf32> to vector<16x8xf32>
    %138 = arith.addf %135, %137 : vector<16x8xf32>
    %c0_48 = arith.constant 0 : index
    %c16 = arith.constant 16 : index
    %139 = vector.load %arg17[%c0_48, %c16] : memref<16x32xf32, #tpu.memory_space<vmem>>, vector<16x8xf32>
    tpu.vector_store %arg17[%c0_48, %c16], %138 {strides = array<i32>} : memref<16x32xf32, #tpu.memory_space<vmem>>, vector<16x8xf32>,
    %c3 = arith.constant 3 : index
    %c0_49 = arith.constant 0 : index
    %c0_50 = arith.constant 0 : index
    %c0_51 = arith.constant 0 : index
    %140 = vector.load %arg11[%c3, %c0_49, %c0_50, %c0_51] : memref<4x4x16x16xf32, #tpu.memory_space<vmem>>, vector<1x4x16x16xf32>
    %141 = vector.shape_cast %140 : vector<1x4x16x16xf32> to vector<4x16x16xf32>
    %cst_52 = arith.constant dense<0.000000e+00> : vector<4x16x8xf32>
    %142 = tpu.matmul %141, %64, %cst_52 {dimension_numbers = #tpu.dot_dimension_numbers<[2], [2], [1], [1], [0, 0, 0, 1, 1, 1], [0], [0]>} : vector<4x16x16xf32>, vector<4x8x16xf32>, vector<4x16x8xf32> -> vector<4x16x8xf32>
    %143 = vector.extract_strided_slice %142 {offsets = [0, 0, 0], sizes = [1, 16, 8], strides = [1, 1, 1]} : vector<4x16x8xf32> to vector<1x16x8xf32>
    %144 = vector.shape_cast %143 : vector<1x16x8xf32> to vector<16x8xf32>
    %145 = vector.extract_strided_slice %142 {offsets = [1, 0, 0], sizes = [1, 16, 8], strides = [1, 1, 1]} : vector<4x16x8xf32> to vector<1x16x8xf32>
    %146 = vector.shape_cast %145 : vector<1x16x8xf32> to vector<16x8xf32>
    %147 = arith.addf %144, %146 : vector<16x8xf32>
    %148 = vector.extract_strided_slice %142 {offsets = [2, 0, 0], sizes = [1, 16, 8], strides = [1, 1, 1]} : vector<4x16x8xf32> to vector<1x16x8xf32>
    %149 = vector.shape_cast %148 : vector<1x16x8xf32> to vector<16x8xf32>
    %150 = arith.addf %147, %149 : vector<16x8xf32>
    %151 = vector.extract_strided_slice %142 {offsets = [3, 0, 0], sizes = [1, 16, 8], strides = [1, 1, 1]} : vector<4x16x8xf32> to vector<1x16x8xf32>
    %152 = vector.shape_cast %151 : vector<1x16x8xf32> to vector<16x8xf32>
    %153 = arith.addf %150, %152 : vector<16x8xf32>
    %c0_53 = arith.constant 0 : index
    %c24 = arith.constant 24 : index
    %154 = vector.load %arg17[%c0_53, %c24] : memref<16x32xf32, #tpu.memory_space<vmem>>, vector<16x8xf32>
    tpu.vector_store %arg17[%c0_53, %c24], %153 {strides = array<i32>} : memref<16x32xf32, #tpu.memory_space<vmem>>, vector<16x8xf32>,
    %c0_54 = arith.constant 0 : index
    %c0_55 = arith.constant 0 : index
    %c0_56 = arith.constant 0 : index
    %c0_57 = arith.constant 0 : index
    %155 = vector.load %arg12[%c0_54, %c0_55, %c0_56, %c0_57] : memref<2x4x16x8xf32, #tpu.memory_space<vmem>>, vector<1x4x16x8xf32>
    %156 = vector.shape_cast %155 : vector<1x4x16x8xf32> to vector<4x16x8xf32>
    %cst_58 = arith.constant dense<0.000000e+00> : vector<4x16x16xf32>
    %157 = tpu.matmul %156, %94, %cst_58 {dimension_numbers = #tpu.dot_dimension_numbers<[2], [1], [1], [2], [0, 0, 0, 1, 1, 2], [0], [0]>} : vector<4x16x8xf32>, vector<4x8x16xf32>, vector<4x16x16xf32> -> vector<4x16x16xf32>
    %158 = vector.extract_strided_slice %157 {offsets = [0, 0, 0], sizes = [1, 16, 16], strides = [1, 1, 1]} : vector<4x16x16xf32> to vector<1x16x16xf32>
    %159 = vector.shape_cast %158 : vector<1x16x16xf32> to vector<16x16xf32>
    %160 = vector.extract_strided_slice %157 {offsets = [1, 0, 0], sizes = [1, 16, 16], strides = [1, 1, 1]} : vector<4x16x16xf32> to vector<1x16x16xf32>
    %161 = vector.shape_cast %160 : vector<1x16x16xf32> to vector<16x16xf32>
    %162 = arith.addf %159, %161 : vector<16x16xf32>
    %163 = vector.extract_strided_slice %157 {offsets = [2, 0, 0], sizes = [1, 16, 16], strides = [1, 1, 1]} : vector<4x16x16xf32> to vector<1x16x16xf32>
    %164 = vector.shape_cast %163 : vector<1x16x16xf32> to vector<16x16xf32>
    %165 = arith.addf %162, %164 : vector<16x16xf32>
    %166 = vector.extract_strided_slice %157 {offsets = [3, 0, 0], sizes = [1, 16, 16], strides = [1, 1, 1]} : vector<4x16x16xf32> to vector<1x16x16xf32>
    %167 = vector.shape_cast %166 : vector<1x16x16xf32> to vector<16x16xf32>
    %168 = arith.addf %165, %167 : vector<16x16xf32>
    %c0_59 = arith.constant 0 : index
    %c0_60 = arith.constant 0 : index
    %169 = vector.load %arg18[%c0_59, %c0_60] : memref<16x32xf32, #tpu.memory_space<vmem>>, vector<16x16xf32>
    tpu.vector_store %arg18[%c0_59, %c0_60], %168 {strides = array<i32>} : memref<16x32xf32, #tpu.memory_space<vmem>>, vector<16x16xf32>,
    %c1_61 = arith.constant 1 : index
    %c0_62 = arith.constant 0 : index
    %c0_63 = arith.constant 0 : index
    %c0_64 = arith.constant 0 : index
    %170 = vector.load %arg12[%c1_61, %c0_62, %c0_63, %c0_64] : memref<2x4x16x8xf32, #tpu.memory_space<vmem>>, vector<1x4x16x8xf32>
    %171 = vector.shape_cast %170 : vector<1x4x16x8xf32> to vector<4x16x8xf32>
    %cst_65 = arith.constant dense<0.000000e+00> : vector<4x16x16xf32>
    %172 = tpu.matmul %171, %94, %cst_65 {dimension_numbers = #tpu.dot_dimension_numbers<[2], [1], [1], [2], [0, 0, 0, 1, 1, 2], [0], [0]>} : vector<4x16x8xf32>, vector<4x8x16xf32>, vector<4x16x16xf32> -> vector<4x16x16xf32>
    %173 = vector.extract_strided_slice %172 {offsets = [0, 0, 0], sizes = [1, 16, 16], strides = [1, 1, 1]} : vector<4x16x16xf32> to vector<1x16x16xf32>
    %174 = vector.shape_cast %173 : vector<1x16x16xf32> to vector<16x16xf32>
    %175 = vector.extract_strided_slice %172 {offsets = [1, 0, 0], sizes = [1, 16, 16], strides = [1, 1, 1]} : vector<4x16x16xf32> to vector<1x16x16xf32>
    %176 = vector.shape_cast %175 : vector<1x16x16xf32> to vector<16x16xf32>
    %177 = arith.addf %174, %176 : vector<16x16xf32>
    %178 = vector.extract_strided_slice %172 {offsets = [2, 0, 0], sizes = [1, 16, 16], strides = [1, 1, 1]} : vector<4x16x16xf32> to vector<1x16x16xf32>
    %179 = vector.shape_cast %178 : vector<1x16x16xf32> to vector<16x16xf32>
    %180 = arith.addf %177, %179 : vector<16x16xf32>
    %181 = vector.extract_strided_slice %172 {offsets = [3, 0, 0], sizes = [1, 16, 16], strides = [1, 1, 1]} : vector<4x16x16xf32> to vector<1x16x16xf32>
    %182 = vector.shape_cast %181 : vector<1x16x16xf32> to vector<16x16xf32>
    %183 = arith.addf %180, %182 : vector<16x16xf32>
    %c0_66 = arith.constant 0 : index
    %c16_67 = arith.constant 16 : index
    %184 = vector.load %arg18[%c0_66, %c16_67] : memref<16x32xf32, #tpu.memory_space<vmem>>, vector<16x16xf32>
    tpu.vector_store %arg18[%c0_66, %c16_67], %183 {strides = array<i32>} : memref<16x32xf32, #tpu.memory_space<vmem>>, vector<16x16xf32>,
    %c0_68 = arith.constant 0 : index
    %c0_69 = arith.constant 0 : index
    %185 = vector.load %arg17[%c0_68, %c0_69] : memref<16x32xf32, #tpu.memory_space<vmem>>, vector<16x32xf32>
    %186 = arith.addf %185, %1 : vector<16x32xf32>
    %c0_70 = arith.constant 0 : index
    %c0_71 = arith.constant 0 : index
    %187 = vector.load %arg18[%c0_70, %c0_71] : memref<16x32xf32, #tpu.memory_space<vmem>>, vector<16x32xf32>
    %188 = arith.addf %187, %1 : vector<16x32xf32>
    %c0_72 = arith.constant 0 : index
    %c0_73 = arith.constant 0 : index
    %189 = vector.load %arg13[%c0_72, %c0_73] : memref<32x32xf32, #tpu.memory_space<vmem>>, vector<32x32xf32>
    %cst_74 = arith.constant dense<0.000000e+00> : vector<16x32xf32>
    %190 = tpu.matmul %186, %189, %cst_74 {dimension_numbers = #tpu.dot_dimension_numbers<[1], [0], [0], [1], [0, 0, 1, 1], [], []>} : vector<16x32xf32>, vector<32x32xf32>, vector<16x32xf32> -> vector<16x32xf32>
    %c0_75 = arith.constant 0 : index
    %c0_76 = arith.constant 0 : index
    %191 = vector.load %arg14[%c0_75, %c0_76] : memref<32x32xf32, #tpu.memory_space<vmem>>, vector<32x32xf32>
    %cst_77 = arith.constant dense<0.000000e+00> : vector<16x32xf32>
    %192 = tpu.matmul %188, %191, %cst_77 {dimension_numbers = #tpu.dot_dimension_numbers<[1], [0], [0], [1], [0, 0, 1, 1], [], []>} : vector<16x32xf32>, vector<32x32xf32>, vector<16x32xf32> -> vector<16x32xf32>
    %193 = arith.addf %190, %192 : vector<16x32xf32>
    %c0_78 = arith.constant 0 : index
    %c0_79 = arith.constant 0 : index
    %194 = vector.load %arg15[%c0_78, %c0_79] : memref<1x32xf32, #tpu.memory_space<vmem>>, vector<1x32xf32>
    %195 = vector.broadcast %194 : vector<1x32xf32> to vector<16x32xf32>
    %196 = arith.addf %193, %195 : vector<16x32xf32>
    %c0_80 = arith.constant 0 : index
    %c0_81 = arith.constant 0 : index
    %c0_82 = arith.constant 0 : index
    %197 = vector.load %arg16[%c0_80, %c0_81, %c0_82] : memref<1x16x32xf32, #tpu.memory_space<vmem>>, vector<1x16x32xf32>
    %198 = vector.shape_cast %197 : vector<1x16x32xf32> to vector<16x32xf32>
    %199 = vector.shape_cast %196 : vector<16x32xf32> to vector<1x16x32xf32>
    tpu.vector_store %arg16[%c0_80, %c0_81, %c0_82], %199 {strides = array<i32>} : memref<1x16x32xf32, #tpu.memory_space<vmem>>, vector<1x16x32xf32>,
    return
  }
  func.func @transform_0(%arg0: i32) -> (i32, i32, i32) {
    %c0_i32 = arith.constant 0 : i32
    %c0_i32_0 = arith.constant 0 : i32
    %c0_i32_1 = arith.constant 0 : i32
    return %arg0, %c0_i32, %c0_i32_0 : i32, i32, i32
  }
  func.func @transform_1(%arg0: i32) -> (i32, i32) {
    %c0_i32 = arith.constant 0 : i32
    %c0_i32_0 = arith.constant 0 : i32
    %c0_i32_1 = arith.constant 0 : i32
    return %c0_i32, %c0_i32_0 : i32, i32
  }
  func.func @transform_2(%arg0: i32) -> (i32, i32) {
    %c0_i32 = arith.constant 0 : i32
    %c0_i32_0 = arith.constant 0 : i32
    %c0_i32_1 = arith.constant 0 : i32
    return %c0_i32, %c0_i32_0 : i32, i32
  }
  func.func @transform_3(%arg0: i32) -> (i32, i32) {
    %c0_i32 = arith.constant 0 : i32
    %c0_i32_0 = arith.constant 0 : i32
    %c0_i32_1 = arith.constant 0 : i32
    return %c0_i32, %c0_i32_0 : i32, i32
  }
  func.func @transform_4(%arg0: i32) -> (i32, i32) {
    %c0_i32 = arith.constant 0 : i32
    %c0_i32_0 = arith.constant 0 : i32
    %c0_i32_1 = arith.constant 0 : i32
    return %c0_i32, %c0_i32_0 : i32, i32
  }
  func.func @transform_5(%arg0: i32) -> (i32, i32) {
    %c0_i32 = arith.constant 0 : i32
    %c0_i32_0 = arith.constant 0 : i32
    %c0_i32_1 = arith.constant 0 : i32
    return %c0_i32, %c0_i32_0 : i32, i32
  }
  func.func @transform_6(%arg0: i32) -> (i32, i32) {
    %c0_i32 = arith.constant 0 : i32
    %c0_i32_0 = arith.constant 0 : i32
    %c0_i32_1 = arith.constant 0 : i32
    return %c0_i32, %c0_i32_0 : i32, i32
  }
  func.func @transform_7(%arg0: i32) -> (i32, i32) {
    %c0_i32 = arith.constant 0 : i32
    %c0_i32_0 = arith.constant 0 : i32
    %c0_i32_1 = arith.constant 0 : i32
    return %c0_i32, %c0_i32_0 : i32, i32
  }
  func.func @transform_8(%arg0: i32) -> (i32, i32) {
    %c0_i32 = arith.constant 0 : i32
    %c0_i32_0 = arith.constant 0 : i32
    %c0_i32_1 = arith.constant 0 : i32
    return %c0_i32, %c0_i32_0 : i32, i32
  }
  func.func @transform_9(%arg0: i32) -> (i32, i32, i32) {
    %c0_i32 = arith.constant 0 : i32
    %c0_i32_0 = arith.constant 0 : i32
    %c0_i32_1 = arith.constant 0 : i32
    %c0_i32_2 = arith.constant 0 : i32
    return %c0_i32, %c0_i32_0, %c0_i32_1 : i32, i32, i32
  }
  func.func @transform_10(%arg0: i32) -> (i32, i32, i32, i32) {
    %c0_i32 = arith.constant 0 : i32
    %c0_i32_0 = arith.constant 0 : i32
    %c0_i32_1 = arith.constant 0 : i32
    %c0_i32_2 = arith.constant 0 : i32
    %c0_i32_3 = arith.constant 0 : i32
    return %c0_i32, %c0_i32_0, %c0_i32_1, %c0_i32_2 : i32, i32, i32, i32
  }
  func.func @transform_11(%arg0: i32) -> (i32, i32, i32, i32) {
    %c0_i32 = arith.constant 0 : i32
    %c0_i32_0 = arith.constant 0 : i32
    %c0_i32_1 = arith.constant 0 : i32
    %c0_i32_2 = arith.constant 0 : i32
    %c0_i32_3 = arith.constant 0 : i32
    return %c0_i32, %c0_i32_0, %c0_i32_1, %c0_i32_2 : i32, i32, i32, i32
  }
  func.func @transform_12(%arg0: i32) -> (i32, i32) {
    %c0_i32 = arith.constant 0 : i32
    %c0_i32_0 = arith.constant 0 : i32
    %c0_i32_1 = arith.constant 0 : i32
    return %c0_i32, %c0_i32_0 : i32, i32
  }
  func.func @transform_13(%arg0: i32) -> (i32, i32) {
    %c0_i32 = arith.constant 0 : i32
    %c0_i32_0 = arith.constant 0 : i32
    %c0_i32_1 = arith.constant 0 : i32
    return %c0_i32, %c0_i32_0 : i32, i32
  }
  func.func @transform_14(%arg0: i32) -> (i32, i32) {
    %c0_i32 = arith.constant 0 : i32
    %c0_i32_0 = arith.constant 0 : i32
    %c0_i32_1 = arith.constant 0 : i32
    return %c0_i32, %c0_i32_0 : i32, i32
  }
  func.func @transform_15(%arg0: i32) -> (i32, i32, i32) {
    %c0_i32 = arith.constant 0 : i32
    %c0_i32_0 = arith.constant 0 : i32
    %c0_i32_1 = arith.constant 0 : i32
    return %arg0, %c0_i32, %c0_i32_0 : i32, i32, i32
  }
}

</mosaic_0001>

<bundles_post_ra>
// kernel: dca_forward.1
= control target key start
LH: loop header
LB: loop body
LE: loop exit
PB: predicated region body
PF: predicated region fallthrough
CT: control target
= control target key end

     0   :  { %s7081_s0 = inlined_call_operand.vmem [shape: f32[2,16,32], index: 0, kind: input, shape index: {}]   ;;  %s7082_s1 = inlined_call_operand.hbm [shape: f32[32,64], index: 1, kind: input, shape index: {}]   ;;  %s7083_s2 = inlined_call_operand.vmem [shape: f32[1,64], index: 2, kind: input, shape index: {}]   ;;  %s7084_s3 = inlined_call_operand.vmem [shape: f32[32,32], index: 3, kind: input, shape index: {}]   ;;  %s7085_s4 = inlined_call_operand.vmem [shape: f32[1,32], index: 4, kind: input, shape index: {}]   ;;  %s7086_s5 = inlined_call_operand.vmem [shape: f32[16,8], index: 5, kind: input, shape index: {}]   ;;  %s7087_s6 = inlined_call_operand.vmem [shape: f32[1,8], index: 6, kind: input, shape index: {}]   ;;  %s7088_s7 = inlined_call_operand.vmem [shape: f32[16,8], index: 7, kind: input, shape index: {}]   ;;  %s7089_s8 = inlined_call_operand.hbm [shape: f32[1,8], index: 8, kind: input, shape index: {}]   ;;  %s7090_s9 = inlined_call_operand.vmem [shape: f32[4,1,1], index: 9, kind: input, shape index: {}]   ;;  %s7091_s10 = inlined_call_operand.vmem [shape: f32[4,4,16,16], index: 10, kind: input, shape index: {}]   ;;  %s7092_s11 = inlined_call_operand.vmem [shape: f32[2,4,16,8], index: 11, kind: input, shape index: {}]   ;;  %s7093_s12 = inlined_call_operand.vmem [shape: f32[32,32], index: 12, kind: input, shape index: {}]   ;;  %s7094_s13 = inlined_call_operand.vmem [shape: f32[32,32], index: 13, kind: input, shape index: {}]   ;;  %s7095_s14 = inlined_call_operand.hbm [shape: f32[1,32], index: 14, kind: input, shape index: {}]   ;;  %s7096_s15 = inlined_call_operand.hbm [shape: f32[2,16,32], index: 15, kind: output, shape index: {}]  }
   0x1   :  { %7110 = sst [smem:[#allocation22_spill]] %s7089_s8 }
   0x2   :  { %7111 = sst [smem:[#allocation23_spill]] %s7096_s15 }
   0x3   :  { %20 = vsyncpa [#allocation5], 0 }
   0x4   :  { %21 = vsyncpa [#allocation8], 0 }
   0x5   :  { %22 = vsyncpa [#allocation6], 0 }
   0x6   :  { %24 = vsyncpa [#allocation6 + $0x1], 0  ;;  %s6323_s18 = smov 0   ;;  %s6325_s19 = smov 0  }
   0x7   :  { %s6327_s20 = smov 0   ;;  %s6329_s21 = smov 0  }
   0x8 LB: > { %7112 = sst [smem:[#allocation14_spill]] %s6212_s18  ;;  %s6344_s22 = sadd.s32 4294967295, %s6224_s21   ;;  %s6224_s21 = sphi %s6329_s21, %s7142_s21   ;;  %s6220_s20 = sphi %s6327_s20, %s7145_s20   ;;  %s6216_s19 = sphi %s6325_s19, %s7144_s19   ;;  %s6212_s18 = sphi %s6323_s18, %s7143_s18  }
   0x9   : > { %7113 = sst [smem:[#allocation15_spill]] %s6216_s19  ;;  %s5184_s23 = sadd.s32 4294967294, %s6224_s21  }
   0xa   : > { %7114 = sst [smem:[#allocation16_spill]] %s6220_s20  ;;  %s6348_s24 = sadd.s32 1, %s6224_s21  }
   0xb   : > { %7115 = sst [smem:[#allocation17_spill]] %s6224_s21  ;;  %s357_s25 = sadd.s32 1, %s6220_s20 }
   0xc   : > { %7116 = sst [smem:[#allocation18_spill]] %s6348_s24  ;;  %s354_s26 = ssub.s32 %s6224_s21, %s6348_s24 }
   0xd   : > { %p367_p0 = scmp.ne.s32.totalorder %s6220_s20, %s6216_s19  ;;  %p355_p1 = scmp.eq.s32.totalorder %s354_s26, 0 }
   0xe   : > { %p368_p2 = scmp.eq.s32.totalorder %s6344_s22, 1  ;;  %p373_p3 = scmp.ne.s32.totalorder %s6216_s19, %s6212_s18 }
   0xf   : > { %p374_p4 = scmp.eq.s32.totalorder %s5184_s23, 1  ;;  %p5185_p7 = scmp.ge.s32.totalorder %s6224_s21, 1 }
  0x10   : > { %s6359_s27 = scalar_select %p355_p1, %s6220_s20, %s357_s25  }
  0x11   : > { %p6361_p5 = por %p368_p2, %p367_p0  ;;  %p6365_p6 = por %p374_p4, %p373_p3 }
  0x12   : > { %7117 = sst [smem:[#allocation19_spill]] %s6359_s27  ;;  %p381_p8 = scmp.lt.s32.totalorder %s6224_s21, 3 }
  0x13   : > { %s7118_s28 = scalar_select %p6361_p5, 1, 0 }
  0x14   : > { %s7120_s29 = scalar_select %p6365_p6, 1, 0 }
  0x15   : > { %7119 = sst [smem:[#allocation20_spill]] %s7118_s28  ;;  %p7104_p9 = scmp.eq.s32.totalorder %s6344_s22, 0 }
  0x16   : > { %7121 = sst [smem:[#allocation21_spill]] %s7120_s29  ;;  %p6372_p10 = pnand %p5185_p7, %p381_p8 }
  0x17   : > { %s6226_s16 = smov [#allocation7]   ;;  %s6227_s23 = smov [#allocation4]  }
  0x18   : > { %s7122_s30 = scalar_select %p6372_p10, 1, 0 }
  0x19   : > { %s425_s17 = sshll.u32 %s6226_s16, 4  ;;  %p5949_p11 = pneg %p6372_p10  ;;  %s426_s17 = int_to_ptr.vmem [resolvable:$true] %s425_s17 }
  0x1a   : > { %s393_s25 = sshll.u32 %s6227_s23, 4  ;;  %s6228_s27 = smov [#allocation9]   ;;  %s6384_s25 = int_to_ptr.vmem [resolvable:$true] %s393_s25 }
  0x1b   : > { %p6380_p12 = pnand %p7104_p9, %p5949_p11  ;;  %s6386_s20 = sshll.u32 %s6228_s27, 4  ;;  %s452_s20 = int_to_ptr.vmem [resolvable:$true] %s6386_s20 }
  0x1c   : > { %s7124_s8 = sld [smem:[#allocation22_spill]] }
  0x1d   : > { %p6396_p0 = pneg %p6380_p12 }
  0x22   : > { %s6070_s16 = scalar_lea.hbm %s7124_s8, 16 }
  0x23   : > { %p6071_p13 = scmp.ne.s32.totalorder %s7124_s8, %s6070_s16  ;;  %p6077_p3 = scmp.lt.u32.totalorder %s6070_s16, %s7124_s8 }
  0x25   : > { %p6073_p1 = pnand %p6396_p0, %p6071_p13 }
  0x27   : > { %p6074_p2 = pneg %p6073_p1 }
  0x29   : > { %p6079_p4 = pnand %p6077_p3, %p6074_p2 }
  0x2b   : > { %6082 = shalt.err (!%p6079_p4)
}
  0x2c   : > { %s6083_s24 = scalar_lea.vmem %s426_s17, 16  ;;  %s6090_s18 = scalar_lea.vmem %s426_s17, 32 }
  0x2d   : > { %p6084_p7 = scmp.ne.s32.totalorder %s426_s17, %s6083_s24  ;;  %p6091_p9 = scmp.lt.s32.totalorder %s426_s17, %s426_s17 }
  0x2e   : > { %p6092_p6 = scmp.lt.s32.totalorder %s6090_s18, %s6083_s24 }
  0x2f   : > { %p6086_p8 = pnand %p6084_p7, %p6396_p0 }
  0x30   : > { %p6093_p5 = por %p6092_p6, %p6091_p9 }
  0x31   : > { %p6087_p11 = pneg %p6086_p8 }
  0x33   : > { %p6094_p10 = pnand %p6093_p5, %p6087_p11 }
  0x35   : > { %6097 = shalt.err (!%p6094_p10)
}
  0x36   : > { %5955 = dma.hbm_to_vmem [thread:$0]  (!%p6380_p12), %s7124_s8, 16, %s426_s17, [#allocation8]  }
  0x37   : > { %s6098_s27 = scalar_lea.hbm %s7082_s1, 512 }
  0x38   : > { %p6099_p13 = scmp.ne.s32.totalorder %s7082_s1, %s6098_s27  ;;  %p6105_p5 = scmp.lt.u32.totalorder %s6098_s27, %s7082_s1 }
  0x3a   : > { %p6101_p1 = pnand %p6099_p13, %p6396_p0 }
  0x3c   : > { %p6102_p6 = pneg %p6101_p1 }
  0x3e   : > { %p6107_p9 = pnand %p6105_p5, %p6102_p6 }
  0x40   : > { %6110 = shalt.err (!%p6107_p9)
}
  0x41   : > { %s6111_s17 = scalar_lea.vmem %s6384_s25, 512  ;;  %p6119_p4 = scmp.lt.s32.totalorder %s6384_s25, %s6384_s25 }
  0x42   : > { %p6112_p10 = scmp.ne.s32.totalorder %s6384_s25, %s6111_s17  ;;  %p6120_p7 = scmp.lt.s32.totalorder %s6111_s17, %s6111_s17 }
  0x44   : > { %p6114_p2 = pnand %p6112_p10, %p6396_p0  ;;  %p6121_p8 = por %p6120_p7, %p6119_p4 }
  0x46   : > { %p6115_p3 = pneg %p6114_p2 }
  0x48   : > { %p6122_p11 = pnand %p6121_p8, %p6115_p3 }
  0x4a   : > { %6125 = shalt.err (!%p6122_p11)
}
  0x4b   : > { %s6229_s19 = smov 128   ;;  %s6230_s28 = smov 8  }
  0x4c   : > { %5952 = dma.hbm_to_vmem [thread:$0]  (!%p6380_p12), %s7082_s1, 512, %s6384_s25, [#allocation5], %s6229_s19, %s6229_s19, %s6230_s28  }
  0x4d   : > { %s6126_s27 = scalar_lea.hbm %s7095_s14, 16 }
  0x4e   : > { %p6127_p13 = scmp.ne.s32.totalorder %s7095_s14, %s6126_s27  ;;  %p6133_p5 = scmp.lt.u32.totalorder %s6126_s27, %s7095_s14 }
  0x50   : > { %p6129_p1 = pnand %p6127_p13, %p6396_p0 }
  0x52   : > { %p6130_p6 = pneg %p6129_p1 }
  0x54   : > { %p6135_p9 = pnand %p6133_p5, %p6130_p6 }
  0x56   : > { %6138 = shalt.err (!%p6135_p9)
}
  0x57   : > { %s6139_s21 = scalar_lea.vmem %s452_s20, 16  ;;  %s6146_s25 = scalar_lea.vmem %s452_s20, 32 }
  0x58   : > { %p6140_p10 = scmp.ne.s32.totalorder %s452_s20, %s6139_s21  ;;  %p6147_p4 = scmp.lt.s32.totalorder %s452_s20, %s452_s20 }
  0x59   : > { %p6148_p7 = scmp.lt.s32.totalorder %s6146_s25, %s6139_s21 }
  0x5a   : > { %p6142_p2 = pnand %p6140_p10, %p6396_p0 }
  0x5b   : > { %p6149_p8 = por %p6148_p7, %p6147_p4 }
  0x5c   : > { %p6143_p3 = pneg %p6142_p2 }
  0x5e   : > { %p6150_p11 = pnand %p6149_p8, %p6143_p3 }
  0x60   : > { %6153 = shalt.err (!%p6150_p11)
}
  0x61   : > { %5958 = dma.hbm_to_vmem [thread:$0]  (!%p6380_p12), %s7095_s14, 16, %s452_s20, [#allocation8]  }
  0x62   : > { %p7126_p13 = scmp.ne.s32.totalorder %s7122_s30, 0 }
  0x63   : > { %p7127_p1 = scmp.eq.s32.totalorder (!%p7126_p13), %s6344_s22, 0 }
  0x64   : > { %472 = sbr.rel (%p7126_p13) target bundleno = 2602 (0xa2a), region = 80 }
  0x6b   : > { %6199 = dma.done.wait (%p7127_p1), [#allocation5], 512   ;;  %p7128_p0 = pmov %p7127_p1 }
  0x6d   : > { %6201 = vsyncadd (%p7128_p0), [#allocation5], 4294966784  ;;  %p7129_p6 = pmov %p7128_p0 }
  0x6e   : > { %p7130_p5 = pmov %p7128_p0 }
  0x6f   : > { %6203 = dma.done.wait (%p7129_p6), [#allocation8], 32  }
  0x70   : > { %6205 = vsyncadd (%p7130_p5), [#allocation8], 4294967264  ;;  %p528_p9 = scmp.lt.s32.totalorder %s6344_s22, 1  ;;  %vm546_vm0 = vcmask 261120   ;;  %v535_v0 = vld [vmem:[#allocation4] sm:$0xff]  ;;  %v536_v1 = vld [vmem:[#allocation4 + $0x8] sm:$0xff] }
  0x71   : > { %v537_v2 = vld [vmem:[#allocation4 + $0x10] sm:$0xff]  ;;  %v5825_v3 = vpack.c.bf16 %v536_v1, %v535_v0  ;;  %v538_v4 = vld [vmem:[#allocation4 + $0x18] sm:$0xff]  ;;  %v628_v7 = vld [vmem:[%s7084_s3] sm:$0xff]  ;;  %v6231_v14 = vmov 0   ;;  %v6232_v22 = vmov 0.0   ;;  %vm6233_vm1 = vmmov 0  }
  0x72   : > { %s529_s8 = scalar_select %p528_p9, %s6344_s22, 1  ;;  %v5829_v6 = vpack.c.bf16 %v538_v4, %v537_v2  ;;  %v629_v8 = vld [vmem:[%s7084_s3 + $0x8] sm:$0xff]  ;;  %v630_v10 = vld [vmem:[%s7084_s3 + $0x10] sm:$0xff]  ;;  %v631_v11 = vld [vmem:[%s7084_s3 + $0x18] sm:$0xff]  ;;  %6018 = vset.pattern.permute.xlu1 %v6231_v14  ;;  %5539 = vmatprep.subr.mxu0 %v6232_v22  ;;  %vm796_vm2 = vcmask 130048   ;;  %vm1141_vm3 = vcmask 64512  }
  0x73   : > { %5826 = vmatprep.subr.bf16.mxu1 %v5825_v3  ;;  %v5833_v9 = vpack.c.bf16 %v629_v8, %v628_v7  ;;  %v5837_v13 = vpack.c.bf16 %v631_v11, %v630_v10  ;;  %v5197_v15 = vld [vmem:[%s7083_s2] ss:$0 sm:$0xff]  ;;  %5541 = vmatprep.mubr.msk.f32.mxu0 %vm6233_vm1, %v6232_v22  ;;  %v5213_v24 = vld [vmem:[%s7090_s9 + $0x2] ss:$0 sm:$0xff]  ;;  %v5214_v25 = vld [vmem:[%s7090_s9 + $0x3] ss:$0 sm:$0xff] }
  0x74   : > { %s5355_s20 = sshll.u32 %s529_s8, 4  ;;  %5828 = vmatpush3.bf16.msra.mxu1 %v5825_v3  ;;  %v5211_v23 = vld [vmem:[%s7090_s9] ss:$0 sm:$0xff]  ;;  %v5212_v26 = vld [vmem:[%s7090_s9 + $0x1] ss:$0 sm:$0xff]  ;;  %s6234_s18 = smov 104   ;;  %vm6706_vm4 = vmpackc.low %vm1141_vm3, %vm1141_vm3 }
  0x75   : > { %s6469_s23 = scalar_lea.vmem %s7081_s0, %s5355_s20  ;;  %5830 = vmatprep.subr.bf16.mxu1 %v5829_v6  ;;  %1122 = vperm.xlu1 %6018, %v5211_v23   ;;  %v5200_v27 = vld [vmem:[%s7085_s4] ss:$0 sm:$0xff]  ;;  %s6235_s17 = smov 120   ;;  %vm3495_vm5 = vcmask 130112   ;;  %vm4885_vm6 = vcmask 261248   ;;  %vm3845_vm7 = vcmask 195712  }
  0x76   : > { %v533_v5 = vld [vmem:[%s6469_s23] sm:$0xff]  ;;  %v534_v12 = vld [vmem:[%s6469_s23 + $0x8] sm:$0xff]  ;;  %s6236_s21 = smov 112   ;;  %s6238_s19 = smov 8   ;;  %vm4195_vm8 = vcmask 261312  }
  0x77   : > { %5525 = vmatprep.mubr.msk.f32.mxu1 %vm546_vm0, %v533_v5  ;;  %s6239_s27 = smov 16   ;;  %s6240_s25 = smov 24  }
  0x78   : > { %5832 = vmatpush3.bf16.msra.mxu1 %v5829_v6  ;;  %s7133_s30 = sld [smem:[#allocation15_spill]]  ;;  %s7134_s15 = sld [smem:[#allocation20_spill]] }
  0x79   : > { %5834 = vmatprep.subr.bf16.mxu1 %v5833_v9  ;;  %1130 = vperm.xlu1 %6018, %v5213_v24   ;;  %s5356_s24 = sshll.u32 %s6344_s22, 8  ;;  %s6241_s20 = smov [#allocation10]  }
  0x7a   : > { %s6158_s26 = sshll.u32 %s6241_s20, 4  ;;  %s6159_s26 = int_to_ptr.vmem [resolvable:$false] %s6158_s26 }
  0x7b   : > { %5526 = vmatmul.mubr.msk.f32.vlgmr.msra.gmra.mrb[0].mxu1 %vm546_vm0, %v534_v12 }
  0x7c   : > { %5836 = vmatpush3.bf16.msra.mxu1 %v5833_v9  ;;  %5536 = vmatprep.mubr.msk.f32.mxu1 %vm546_vm0, %v533_v5 }
  0x7d   : > { %5838 = vmatprep.subr.bf16.mxu1 %v5837_v13  ;;  %1134 = vperm.xlu1 %6018, %v5214_v25  }
  0x7e   : > { %p7137_p10 = scmp.ne.s32.totalorder %s7134_s15, 0 }
  0x80   : > { %5840 = vmatpush3.bf16.msra.mxu1 %v5837_v13 }
  0x81   : > { %5544 = vmatprep.subr.mxu1 %v6232_v22 }
  0x83   : > { %5537 = vmatmul.mubr.msk.f32.vlgmr.msra.gmra.mrb[2].mxu1 %vm546_vm0, %v534_v12 }
  0x84   : > { %5546 = vmatprep.mubr.msk.f32.mxu1 %vm6233_vm1, %v6232_v22 }
  0xf4   : > { %v6563_v41 = vpop.permute.xlu1 %1122 }
  0xf8   : > { %v6567_v48 = vpop.permute.xlu1 %1130 }
  0xfc   : > { %v6572_v56 = vpop.permute.xlu1 %1134 }
 0x14e   : > { %v5527_v16 = vpop.f32.mrb[0].mxu1 }
 0x14f   : > { %v619_v17 = vpop.f32.mrb[1].mxu1  ;;  %v6495_v19 = vadd.f32 %v5527_v16, %v5197_v15 }
 0x150   : > { %v6492_v18 = vadd.f32 %v5197_v15, %v619_v17 }
 0x152   : > { %714 = vxpose.xlu0.b32.start [1/2] (short) (narrow) %v6492_v18, 64 }
 0x156   : > { %715 = vxpose.xlu0.b32.end [2/2] (short) (narrow) %v6495_v19, 64  ;;  %v5538_v20 = vpop.f32.mrb[2].mxu1 }
 0x157   : > { %v705_v21 = vpop.f32.mrb[3].mxu1  ;;  %v711_v29 = vadd.f32 %v5538_v20, %v5200_v27 }
 0x158   : > { %v706_v28 = vadd.f32 %v5200_v27, %v705_v21  ;;  %v1478_v27 = vld [vmem:[%s7086_s5] sm:$0xff] }
 0x17f   : > { %6019 = vset.pattern.permute.xlu0 %v6231_v14 }
 0x197   : > { %1126 = vperm.xlu0 %6019, %v5212_v26   ;;  %v6237_v26 = vmov 0.0|0.0  }
 0x1b5   : > { %746 = vxpose.xlu0.b32.start [1/2] (short) (narrow) %v706_v28, 32  ;;  %v1479_v28 = vld [vmem:[%s7086_s5 + $0x8] sm:$0xff] }
 0x1b9   : > { %747 = vxpose.xlu0.b32.end [2/2] (short) (narrow) %v711_v29, 32 }
 0x1d2   : > { %v730_v30 = vpop.trf.xlu0 }
 0x1d6   : > { %v731_v31 = vpop.trf.xlu0 }
 0x1da   : > { %v732_v32 = vpop.trf.xlu0 }
 0x1de   : > { %v733_v33 = vpop.trf.xlu0 }
 0x1e2   : > { %v6519_v34 = vpop.trf.xlu0 }
 0x1e3   : > { %5540 = vmatpush3.xpose.msk.msra.mxu0 %vm796_vm2, %v6519_v34 }
 0x1e4   : > { %5549 = vmatprep.subr.mxu0 %v6232_v22 }
 0x1e6   : > { %5542 = vmatmul.mubr.msk.f32.vlgmr.msra.gmra.mrb[0].mxu0 %vm796_vm2, %v730_v30  ;;  %v6525_v35 = vpop.trf.xlu0  ;;  %v5842_v30 = vpack.c.bf16 %v1479_v28, %v1478_v27 }
 0x1e7   : > { %5545 = vmatpush3.xpose.msk.msra.mxu1 %vm796_vm2, %v6525_v35  ;;  %5551 = vmatprep.mubr.msk.f32.mxu0 %vm6233_vm1, %v6232_v22 }
 0x1e8   : > { %5554 = vmatprep.subr.mxu1 %v6232_v22 }
 0x1ea   : > { %790 = vrot.lane.b32.xlu0 %v6495_v19, %s6234_s18  ;;  %5547 = vmatmul.mubr.msk.f32.vlgmr.msra.gmra.mrb[4].mxu1 %vm796_vm2, %v731_v31  ;;  %v6535_v36 = vpop.trf.xlu0 }
 0x1eb   : > { %5550 = vmatpush3.xpose.msk.msra.mxu0 %vm796_vm2, %v6535_v36  ;;  %5556 = vmatprep.mubr.msk.f32.mxu1 %vm6233_vm1, %v6232_v22 }
 0x1ec   : > { %5559 = vmatprep.subr.mxu0 %v6232_v22 }
 0x1ee   : > { %5552 = vmatmul.mubr.msk.f32.vlgmr.msra.gmra.mrb[2].mxu0 %vm796_vm2, %v732_v32  ;;  %v6543_v37 = vpop.trf.xlu0 }
 0x1ef   : > { %5555 = vmatpush3.xpose.msk.msra.mxu1 %vm796_vm2, %v6543_v37  ;;  %5561 = vmatprep.mubr.msk.f32.mxu0 %vm6233_vm1, %v6232_v22 }
 0x1f0   : > { %5564 = vmatprep.subr.mxu1 %v6232_v22 }
 0x1f2   : > { %5557 = vmatmul.mubr.msk.f32.vlgmr.msra.gmra.mrb[6].mxu1 %vm796_vm2, %v733_v33 }
 0x1f3   : > { %5566 = vmatprep.mubr.msk.f32.mxu1 %vm6233_vm1, %v6232_v22 }
 0x216   : > { %v6553_v38 = vpop.permute.xlu0 %1126 }
 0x235   : > { %v6555_v39 = vpop.trf.xlu0 }
 0x236   : > { %5560 = vmatpush3.msra.mxu0 %v6555_v39 }
 0x237   : > { %5569 = vmatprep.subr.mxu0 %v6232_v22 }
 0x239   : > { %v6559_v40 = vpop.trf.xlu0 }
 0x23a   : > { %5565 = vmatpush3.msra.mxu1 %v6559_v40 }
 0x23b   : > { %5574 = vmatprep.subr.mxu1 %v6232_v22 }
 0x23d   : > { %v764_v24 = vpop.trf.xlu0 }
 0x2b9   : > { %v869_v42 = vpop.f32.mrb[0].mxu0 }
 0x2ba   : > { %v1137_v43 = vmul.f32 %v6563_v41, %v869_v42  ;;  %v5543_v44 = vpop.f32.mrb[1].mxu0  ;;  %v1480_v42 = vld [vmem:[%s7088_s7] sm:$0xff] }
 0x2bb   : > { %v765_v44 = vpop.trf.xlu0 }
 0x2bc   : > { %v1142_v45 = vsel %vm1141_vm3, %v1137_v43, -inf }
 0x2bd   : > { %1143 = vmax.xlane.f32.xlu1 %v1142_v45  ;;  %v945_v46 = vpop.f32.mrb[4].mxu1 }
 0x2be   : > { %v5548_v47 = vpop.f32.mrb[5].mxu1  ;;  %v1138_v52 = vmul.f32 %v6553_v38, %v945_v46 }
 0x2c0   : > { %v1145_v58 = vsel %vm1141_vm3, %v1138_v52, -inf }
 0x2c1   : > { %v1021_v49 = vpop.f32.mrb[2].mxu0 }
 0x2c2   : > { %v1139_v50 = vmul.f32 %v6567_v48, %v1021_v49  ;;  %v5553_v51 = vpop.f32.mrb[3].mxu0 }
 0x2c4   : > { %v1148_v53 = vsel %vm1141_vm3, %v1139_v50, -inf }
 0x2c5   : > { %1149 = vmax.xlane.f32.xlu1 %v1148_v53  ;;  %v1097_v54 = vpop.f32.mrb[6].mxu1 }
 0x2c6   : > { %v5558_v55 = vpop.f32.mrb[7].mxu1  ;;  %v1140_v57 = vmul.f32 %v6572_v56, %v1097_v54 }
 0x2c8   : > { %v1151_v59 = vsel %vm1141_vm3, %v1140_v57, -inf }
 0x2c9   : > { %1146 = vmax.xlane.f32.xlu1 %v1145_v58 }
 0x2cd   : > { %1152 = vmax.xlane.f32.xlu1 %v1151_v59 }
 0x34a   : > { %v1144_v60 = vpop.xlane.xlu1 %1143 }
 0x34b   : > { %v1154_v61 = vsub.f32 %v1137_v43, %v1144_v60  ;;  %v1481_v43 = vld [vmem:[%s7088_s7 + $0x8] sm:$0xff] }
 0x34c   : > { %v5854_v46 = vpack.c.bf16 %v1481_v43, %v1480_v42 }
 0x34d   : > { %v1158_v62 = vmul.f32 1.442695, %v1154_v61 }
 0x34f   : > { %6020 = vpow2.f32 %v1158_v62 }
 0x352   : > { %v1150_v63 = vpop.xlane.xlu1 %1149 }
 0x353   : > { %v1156_v0 = vsub.f32 %v1139_v50, %v1150_v63 }
 0x355   : > { %v1162_v1 = vmul.f32 1.442695, %v1156_v0 }
 0x356   : > { %v1147_v2 = vpop.xlane.xlu1 %1146 }
 0x357   : > { %6022 = vpow2.f32 %v1162_v1  ;;  %v1155_v3 = vsub.f32 %v1138_v52, %v1147_v2 }
 0x359   : > { %v6021_v4 = vpop.eup %6020  ;;  %v1160_v5 = vmul.f32 1.442695, %v1155_v3 }
 0x35a   : > { %v1153_v6 = vpop.xlane.xlu1 %1152  ;;  %v1166_v7 = vsel %vm1141_vm3, %v6021_v4, 0.0 }
 0x35b   : > { %6024 = vpow2.f32 %v1160_v5  ;;  %v1157_v8 = vsub.f32 %v1140_v57, %v1153_v6  ;;  %1167 = vadd.xlane.f32.xlu1 %v1166_v7 }
 0x35d   : > { %v1164_v9 = vmul.f32 1.442695, %v1157_v8  ;;  %v791_v8 = vpop.permute.xlu0 %790 }
 0x35f   : > { %6026 = vpow2.f32 %v1164_v9 }
 0x361   : > { %v6023_v10 = vpop.eup %6022 }
 0x362   : > { %v1172_v11 = vsel %vm1141_vm3, %v6023_v10, 0.0 }
 0x363   : > { %1173 = vadd.xlane.f32.xlu1 %v1172_v11 }
 0x365   : > { %v6025_v12 = vpop.eup %6024 }
 0x366   : > { %v1169_v13 = vsel %vm1141_vm3, %v6025_v12, 0.0 }
 0x367   : > { %1170 = vadd.xlane.f32.xlu1 %v1169_v13 }
 0x369   : > { %v6027_v14 = vpop.eup %6026 }
 0x36a   : > { %v1175_v15 = vsel %vm1141_vm3, %v6027_v14, 0.0 }
 0x36b   : > { %1176 = vadd.xlane.f32.xlu1 %v1175_v15 }
 0x37c   : > { %780 = vrot.lane.b32.xlu1 %v6492_v18, %s6235_s17 }
 0x380   : > { %782 = vrot.lane.b32.xlu1 %v6495_v19, %s6235_s17 }
 0x384   : > { %784 = vrot.lane.b32.xlu1 %v6492_v18, %s6236_s21 }
 0x388   : > { %786 = vrot.lane.b32.xlu1 %v6495_v19, %s6236_s21  ;;  %s7135_s21 = sld [smem:[#allocation23_spill]] }
 0x38c   : > { %788 = vrot.lane.b32.xlu1 %v6492_v18, %s6234_s18 }
 0x38e   : > { %s7035_s28 = scalar_lea.hbm %s7135_s21, %s5356_s24 }
 0x3e8   : > { %v1168_v16 = vpop.xlane.xlu1 %1167 }
 0x3e9   : > { %6028 = vrcp.f32 %v1168_v16 }
 0x3f0   : > { %v1174_v17 = vpop.xlane.xlu1 %1173 }
 0x3f1   : > { %6030 = vrcp.f32 %v1174_v17 }
 0x3f3   : > { %v6029_v20 = vpop.eup %6028 }
 0x3f4   : > { %v1182_v21 = vmul.f32 %v6029_v20, %v6021_v4  ;;  %v1171_v23 = vpop.xlane.xlu1 %1170 }
 0x3f5   : > { %6032 = vrcp.f32 %v1171_v23 }
 0x3f6   : > { %5562 = vmatmul.mubr.msk.f32.vlgmr.msra.gmra.mrb[4].mxu0 %vm1141_vm3, %v1182_v21 }
 0x3f7   : > { %5570 = vmatpush3.msra.mxu0 %v764_v24  ;;  %5571 = vmatprep.mubr.msk.f32.mxu0 %vm6233_vm1, %v6232_v22 }
 0x3f8   : > { %v1177_v25 = vpop.xlane.xlu1 %1176  ;;  %5841 = vmatprep.subr.bf16.mxu0 %v6237_v26 }
 0x3f9   : > { %6034 = vrcp.f32 %v1177_v25 }
 0x3fb   : > { %v6031_v29 = vpop.eup %6030 }
 0x3fc   : > { %v1184_v31 = vmul.f32 %v6031_v29, %v6023_v10 }
 0x3fe   : > { %5572 = vmatmul.mubr.msk.f32.vlgmr.msra.gmra.mrb[6].mxu0 %vm1141_vm3, %v1184_v31 }
 0x3ff   : > { %v6033_v32 = vpop.eup %6032  ;;  %5843 = vmatpush3.bf16.msra.mxu0 %v5842_v30  ;;  %5583 = vmatprep.mubr.msk.f32.mxu0 %vm6233_vm1, %v6232_v22 }
 0x400   : > { %v1183_v33 = vmul.f32 %v6033_v32, %v6025_v12  ;;  %5847 = vmatprep.subr.bf16.mxu0 %v6237_v26 }
 0x402   : > { %5567 = vmatmul.mubr.msk.f32.vlgmr.msra.gmra.mrb[8].mxu1 %vm1141_vm3, %v1183_v33  ;;  %5584 = vmatmul.mubr.msk.f32.vlgmr.msra.gmra.mrb[8].mxu0 %vm796_vm2, %v6519_v34  ;;  %v781_v34 = vpop.permute.xlu1 %780 }
 0x403   : > { %v6035_v45 = vpop.eup %6034  ;;  %5849 = vmatpush3.bf16.msra.mxu0 %v5842_v30  ;;  %5575 = vmatpush3.msra.mxu1 %v765_v44 }
 0x404   : > { %v1185_v47 = vmul.f32 %v6035_v45, %v6027_v14  ;;  %5576 = vmatprep.mubr.msk.f32.mxu1 %vm6233_vm1, %v6232_v22  ;;  %5597 = vmatprep.mubr.msk.f32.mxu0 %vm6233_vm1, %v6232_v22 }
 0x405   : > { %5844 = vmatprep.subr.bf16.mxu1 %v6237_v26  ;;  %5853 = vmatprep.subr.bf16.mxu0 %v6237_v26 }
 0x406   : > { %5577 = vmatmul.mubr.msk.f32.vlgmr.msra.gmra.mrb[10].mxu1 %vm1141_vm3, %v1185_v47  ;;  %5598 = vmatmul.mubr.msk.f32.vlgmr.msra.gmra.mrb[10].mxu0 %vm796_vm2, %v6535_v36  ;;  %v783_v36 = vpop.permute.xlu1 %782 }
 0x407   : > { %5846 = vmatpush3.bf16.msra.mxu1 %v5842_v30  ;;  %5855 = vmatpush3.bf16.msra.mxu0 %v5854_v46 }
 0x408   : > { %5590 = vmatprep.mubr.msk.f32.mxu1 %vm6233_vm1, %v6232_v22  ;;  %5611 = vmatprep.mubr.msk.f32.mxu0 %vm6233_vm1, %v6232_v22 }
 0x409   : > { %5850 = vmatprep.subr.bf16.mxu1 %v6237_v26  ;;  %5859 = vmatprep.subr.bf16.mxu0 %v6237_v26 }
 0x40a   : > { %5591 = vmatmul.mubr.msk.f32.vlgmr.msra.gmra.mrb[12].mxu1 %vm796_vm2, %v6525_v35  ;;  %5612 = vmatmul.mubr.msk.f32.vlgmr.msra.gmra.mrb[12].mxu0 %vm796_vm2, %v6555_v39  ;;  %v785_v39 = vpop.permute.xlu1 %784 }
 0x40b   : > { %5852 = vmatpush3.bf16.msra.mxu1 %v5842_v30  ;;  %5861 = vmatpush3.bf16.msra.mxu0 %v5854_v46 }
 0x40c   : > { %5604 = vmatprep.mubr.msk.f32.mxu1 %vm6233_vm1, %v6232_v22  ;;  %5625 = vmatprep.mubr.msk.f32.mxu0 %vm6233_vm1, %v6232_v22 }
 0x40d   : > { %5856 = vmatprep.subr.bf16.mxu1 %v6237_v26 }
 0x40e   : > { %5605 = vmatmul.mubr.msk.f32.vlgmr.msra.gmra.mrb[14].mxu1 %vm796_vm2, %v6543_v37  ;;  %5626 = vmatmul.mubr.msk.f32.vlgmr.msra.gmra.mrb[14].mxu0 %vm796_vm2, %v764_v24  ;;  %v787_v55 = vpop.permute.xlu1 %786 }
 0x40f   : > { %5858 = vmatpush3.bf16.msra.mxu1 %v5854_v46  ;;  %5637 = vmatprep.mubr.msk.f32.mxu0 %vm1141_vm3, %v6492_v18 }
 0x410   : > { %5618 = vmatprep.mubr.msk.f32.mxu1 %vm6233_vm1, %v6232_v22  ;;  %5862 = vmatprep.subr.bf16.mxu1 %v6237_v26 }
 0x412   : > { %5619 = vmatmul.mubr.msk.f32.vlgmr.msra.gmra.mrb[16].mxu1 %vm796_vm2, %v6559_v40  ;;  %v5219_v40 = vld [vmem:[%s7087_s6] ss:$0 sm:$0xff]  ;;  %v789_v3 = vpop.permute.xlu1 %788 }
 0x413   : > { %5864 = vmatpush3.bf16.msra.mxu1 %v5854_v46  ;;  %5632 = vmatprep.mubr.msk.f32.mxu1 %vm6233_vm1, %v6232_v22 }
 0x416   : > { %5633 = vmatmul.mubr.msk.f32.vlgmr.msra.gmra.mrb[18].mxu1 %vm796_vm2, %v765_v44 }
 0x417   : > { %5642 = vmatprep.mubr.msk.f32.mxu1 %vm1141_vm3, %v781_v34 }
 0x4c9   : > { %v6648_v35 = vpop.f32.mrb[4].mxu0 }
 0x4ca   : > { %v5563_v18 = vpop.f32.mrb[5].mxu0 }
 0x4d1   : > { %v6650_v37 = vpop.f32.mrb[6].mxu0 }
 0x4d2   : > { %v5573_v49 = vpop.f32.mrb[7].mxu0 }
 0x4d5   : > { %v6655_v50 = vpop.f32.mrb[8].mxu1  ;;  %v1555_v51 = vpop.f32.mrb[8].mxu0 }
 0x4d6   : > { %v1556_v52 = vadd.f32 %v5219_v40, %v1555_v51  ;;  %v5568_v53 = vpop.f32.mrb[9].mxu1  ;;  %v5585_v54 = vpop.f32.mrb[9].mxu0 }
 0x4d8   : > { %5635 = vmatprep.subr.mxu0 %v1556_v52 }
 0x4d9   : > { %v6657_v57 = vpop.f32.mrb[10].mxu1  ;;  %v1695_v58 = vpop.f32.mrb[10].mxu0  ;;  %5636 = vmatpush3.msra.mxu0 %v1556_v52 }
 0x4da   : > { %v1696_v59 = vadd.f32 %v5219_v40, %v1695_v58  ;;  %v5578_v60 = vpop.f32.mrb[11].mxu1  ;;  %v5599_v61 = vpop.f32.mrb[11].mxu0  ;;  %5638 = vmatmul.mubr.msk.f32.vlgmr.msra.gmra.mrb[16].mxu0 %vm1141_vm3, %v6495_v19 }
 0x4db   : > { %5647 = vmatprep.mubr.msk.f32.mxu0 %vm1141_vm3, %v785_v39 }
 0x4dc   : > { %5645 = vmatprep.subr.mxu0 %v1696_v59 }
 0x4dd   : > { %v1625_v62 = vpop.f32.mrb[12].mxu1  ;;  %v6662_v63 = vpop.f32.mrb[12].mxu0  ;;  %5646 = vmatpush3.msra.mxu0 %v1696_v59 }
 0x4de   : > { %v1626_v0 = vadd.f32 %v5219_v40, %v1625_v62  ;;  %v5592_v1 = vpop.f32.mrb[13].mxu1  ;;  %v5613_v2 = vpop.f32.mrb[13].mxu0  ;;  %5648 = vmatmul.mubr.msk.f32.vlgmr.msra.gmra.mrb[18].mxu0 %vm1141_vm3, %v787_v55  ;;  %5865 = vmatprep.subr.bf16.mxu0 %v6237_v26 }
 0x4df   : > { %5659 = vmatprep.mubr.msk.f32.mxu0 %vm6233_vm1, %v6232_v22 }
 0x4e0   : > { %5640 = vmatprep.subr.mxu1 %v1626_v0 }
 0x4e1   : > { %v1765_v19 = vpop.f32.mrb[14].mxu1  ;;  %v6668_v4 = vpop.f32.mrb[14].mxu0  ;;  %5641 = vmatpush3.msra.mxu1 %v1626_v0 }
 0x4e2   : > { %v1766_v5 = vadd.f32 %v5219_v40, %v1765_v19  ;;  %v5606_v6 = vpop.f32.mrb[15].mxu1  ;;  %v5627_v7 = vpop.f32.mrb[15].mxu0  ;;  %5643 = vmatmul.mubr.msk.f32.vlgmr.msra.gmra.mrb[20].mxu1 %vm1141_vm3, %v783_v36 }
 0x4e3   : > { %5652 = vmatprep.mubr.msk.f32.mxu1 %vm1141_vm3, %v789_v3 }
 0x4e4   : > { %5650 = vmatprep.subr.mxu1 %v1766_v5 }
 0x4e5   : > { %v6672_v9 = vpop.f32.mrb[16].mxu1  ;;  %5651 = vmatpush3.msra.mxu1 %v1766_v5 }
 0x4e6   : > { %v5620_v10 = vpop.f32.mrb[17].mxu1  ;;  %5653 = vmatmul.mubr.msk.f32.vlgmr.msra.gmra.mrb[22].mxu1 %vm1141_vm3, %v791_v8  ;;  %5869 = vmatprep.subr.bf16.mxu1 %v6237_v26 }
 0x4e7   : > { %5666 = vmatprep.mubr.msk.f32.mxu1 %vm6233_vm1, %v6232_v22 }
 0x4e9   : > { %v6678_v11 = vpop.f32.mrb[18].mxu1 }
 0x4ea   : > { %v5634_v12 = vpop.f32.mrb[19].mxu1 }
 0x5ad   : > { %v5639_v13 = vpop.f32.mrb[16].mxu0 }
 0x5ae   : > { %v2385_v14 = vmul.f32 %v5639_v13, %v6563_v41  ;;  %v2138_v15 = vpop.f32.mrb[17].mxu0 }
 0x5af   : > { %v2384_v16 = vmul.f32 %v2138_v15, %v6563_v41 }
 0x5b0   : > { %v2395_v17 = vsel %vm1141_vm3, %v2385_v14, -inf }
 0x5b1   : > { %2396 = vmax.xlane.f32.xlu1 %v2395_v17  ;;  %v5649_v20 = vpop.f32.mrb[18].mxu0  ;;  %v2392_v24 = vsel %vm1141_vm3, %v2384_v16, -inf }
 0x5b2   : > { %v2296_v21 = vpop.f32.mrb[19].mxu0  ;;  %v2389_v33 = vmul.f32 %v5649_v20, %v6567_v48 }
 0x5b3   : > { %v2388_v23 = vmul.f32 %v2296_v21, %v6567_v48 }
 0x5b4   : > { %v2407_v44 = vsel %vm1141_vm3, %v2389_v33, -inf }
 0x5b5   : > { %2393 = vmax.xlane.f32.xlu1 %v2392_v24  ;;  %v5644_v25 = vpop.f32.mrb[20].mxu1  ;;  %v2404_v27 = vsel %vm1141_vm3, %v2388_v23, -inf }
 0x5b6   : > { %2405 = vmax.xlane.f32.xlu0 %v2404_v27  ;;  %v2217_v28 = vpop.f32.mrb[21].mxu1  ;;  %v2387_v30 = vmul.f32 %v5644_v25, %v6553_v38 }
 0x5b7   : > { %v2386_v29 = vmul.f32 %v2217_v28, %v6553_v38 }
 0x5b8   : > { %v2401_v42 = vsel %vm1141_vm3, %v2387_v30, -inf }
 0x5b9   : > { %v5654_v41 = vpop.f32.mrb[22].mxu1  ;;  %v2398_v31 = vsel %vm1141_vm3, %v2386_v29, -inf }
 0x5ba   : > { %2399 = vmax.xlane.f32.xlu1 %v2398_v31  ;;  %v2375_v32 = vpop.f32.mrb[23].mxu1  ;;  %v2391_v45 = vmul.f32 %v5654_v41, %v6572_v56 }
 0x5bb   : > { %v2390_v43 = vmul.f32 %v2375_v32, %v6572_v56 }
 0x5bc   : > { %v2413_v38 = vsel %vm1141_vm3, %v2391_v45, -inf }
 0x5bd   : > { %v2410_v46 = vsel %vm1141_vm3, %v2390_v43, -inf }
 0x5be   : > { %2402 = vmax.xlane.f32.xlu1 %v2401_v42 }
 0x5c2   : > { %2408 = vmax.xlane.f32.xlu1 %v2407_v44 }
 0x5c6   : > { %2411 = vmax.xlane.f32.xlu1 %v2410_v46 }
 0x5ca   : > { %2414 = vmax.xlane.f32.xlu1 %v2413_v38 }
 0x63e   : > { %v2397_v47 = vpop.xlane.xlu1 %2396 }
 0x63f   : > { %v2417_v34 = vsub.f32 %v2385_v14, %v2397_v47  ;;  %v5224_v47 = vld [vmem:[#allocation7] ss:$0 sm:$0xff] }
 0x641   : > { %v2426_v18 = vmul.f32 1.442695, %v2417_v34 }
 0x642   : > { %v2394_v48 = vpop.xlane.xlu1 %2393 }
 0x643   : > { %6036 = vpow2.f32 %v2426_v18  ;;  %v2416_v36 = vsub.f32 %v2384_v16, %v2394_v48  ;;  %v2406_v49 = vpop.xlane.xlu0 %2405  ;;  %v1846_v18 = vadd.f32 %v5224_v47, %v6662_v63 }
 0x644   : > { %v2420_v52 = vsub.f32 %v2388_v23, %v2406_v49 }
 0x645   : > { %v2424_v39 = vmul.f32 1.442695, %v2416_v36 }
 0x646   : > { %v2432_v58 = vmul.f32 1.442695, %v2420_v52 }
 0x647   : > { %6038 = vpow2.f32 %v2424_v39  ;;  %v2400_v40 = vpop.xlane.xlu1 %2399 }
 0x648   : > { %v2418_v51 = vsub.f32 %v2386_v29, %v2400_v40 }
 0x64a   : > { %v2428_v53 = vmul.f32 1.442695, %v2418_v51 }
 0x64b   : > { %v2403_v56 = vpop.xlane.xlu1 %2402 }
 0x64c   : > { %6040 = vpow2.f32 %v2428_v53  ;;  %v2419_v54 = vsub.f32 %v2387_v30, %v2403_v56 }
 0x64d   : > { %v6037_v55 = vpop.eup %6036 }
 0x64e   : > { %v2430_v59 = vmul.f32 1.442695, %v2419_v54  ;;  %v2443_v60 = vsel %vm1141_vm3, %v6037_v55, 0.0  ;;  %v1919_v54 = vadd.f32 %v5224_v47, %v6672_v9  ;;  %v2796_v9 = vld [vmem:[%s7091_s10] sm:$0xff] }
 0x64f   : > { %v2409_v61 = vpop.xlane.xlu1 %2408  ;;  %2444 = vadd.xlane.f32.xlu1 %v2443_v60 }
 0x650   : > { %6042 = vpow2.f32 %v2430_v59  ;;  %v2421_v62 = vsub.f32 %v2389_v33, %v2409_v61  ;;  %v2065_v61 = vadd.f32 %v5224_v47, %v6678_v11  ;;  %v5262_v11 = vld [vmem:[%s7091_s10 + $0x48] sm:$0xff] }
 0x651   : > { %v6039_v0 = vpop.eup %6038  ;;  %6044 = vpow2.f32 %v2432_v58 }
 0x652   : > { %v2434_v1 = vmul.f32 1.442695, %v2421_v62  ;;  %v2440_v2 = vsel %vm1141_vm3, %v6039_v0, 0.0  ;;  %v5261_v62 = vld [vmem:[%s7091_s10 + $0x40] sm:$0xff] }
 0x653   : > { %2441 = vadd.xlane.f32.xlu1 %v2440_v2  ;;  %v2412_v3 = vpop.xlane.xlu1 %2411  ;;  %v5263_v2 = vld [vmem:[%s7091_s10 + $0x50] sm:$0xff] }
 0x654   : > { %6046 = vpow2.f32 %v2434_v1  ;;  %v2422_v19 = vsub.f32 %v2390_v43, %v2412_v3  ;;  %v2800_v1 = vld [vmem:[%s7091_s10 + $0x20] sm:$0xff]  ;;  %v5264_v3 = vld [vmem:[%s7091_s10 + $0x58] sm:$0xff] }
 0x656   : > { %v6041_v5 = vpop.eup %6040  ;;  %v2436_v6 = vmul.f32 1.442695, %v2422_v19  ;;  %v2801_v19 = vld [vmem:[%s7091_s10 + $0x28] sm:$0xff] }
 0x657   : > { %v2415_v7 = vpop.xlane.xlu1 %2414  ;;  %v2446_v8 = vsel %vm1141_vm3, %v6041_v5, 0.0 }
 0x658   : > { %6048 = vpow2.f32 %v2436_v6  ;;  %v2423_v10 = vsub.f32 %v2391_v45, %v2415_v7  ;;  %2447 = vadd.xlane.f32.xlu1 %v2446_v8  ;;  %v5265_v6 = vld [vmem:[%s7091_s10 + $0x60] sm:$0xff]  ;;  %v5266_v7 = vld [vmem:[%s7091_s10 + $0x68] sm:$0xff]  ;;  %v2803_v8 = vld [vmem:[%s7091_s10 + $0x38] sm:$0xff] }
 0x65a   : > { %v6043_v12 = vpop.eup %6042  ;;  %v2438_v13 = vmul.f32 1.442695, %v2423_v10  ;;  %v5281_v10 = vld [vmem:[%s7091_s10 + $0x80] sm:$0xff] }
 0x65b   : > { %v2449_v14 = vsel %vm1141_vm3, %v6043_v12, 0.0  ;;  %v6045_v15 = vpop.eup %6044 }
 0x65c   : > { %6050 = vpow2.f32 %v2438_v13  ;;  %2450 = vadd.xlane.f32.xlu1 %v2449_v14  ;;  %v2452_v20 = vsel %vm1141_vm3, %v6045_v15, 0.0  ;;  %v5282_v13 = vld [vmem:[%s7091_s10 + $0x88] sm:$0xff]  ;;  %v5283_v14 = vld [vmem:[%s7091_s10 + $0x90] sm:$0xff] }
 0x65e   : > { %v6047_v16 = vpop.eup %6046 }
 0x65f   : > { %v2455_v17 = vsel %vm1141_vm3, %v6047_v16, 0.0 }
 0x660   : > { %2456 = vadd.xlane.f32.xlu0 %v2455_v17  ;;  %2453 = vadd.xlane.f32.xlu1 %v2452_v20  ;;  %v5302_v17 = vld [vmem:[%s7091_s10 + $0xc8] sm:$0xff]  ;;  %v5284_v20 = vld [vmem:[%s7091_s10 + $0x98] sm:$0xff] }
 0x662   : > { %v6049_v21 = vpop.eup %6048 }
 0x663   : > { %v2458_v23 = vsel %vm1141_vm3, %v6049_v21, 0.0 }
 0x664   : > { %2459 = vadd.xlane.f32.xlu1 %v2458_v23  ;;  %v5286_v23 = vld [vmem:[%s7091_s10 + $0xa8] sm:$0xff] }
 0x666   : > { %v6051_v24 = vpop.eup %6050 }
 0x667   : > { %v2461_v25 = vsel %vm1141_vm3, %v6051_v24, 0.0 }
 0x668   : > { %2462 = vadd.xlane.f32.xlu0 %v2461_v25  ;;  %v5306_v25 = vld [vmem:[%s7091_s10 + $0xe8] sm:$0xff] }
 0x6dc   : > { %v2445_v27 = vpop.xlane.xlu1 %2444 }
 0x6dd   : > { %6052 = vrcp.f32 %v2445_v27  ;;  %v5307_v27 = vld [vmem:[%s7091_s10 + $0xf0] sm:$0xff] }
 0x6e0   : > { %v2442_v28 = vpop.xlane.xlu1 %2441 }
 0x6e1   : > { %6054 = vrcp.f32 %v2442_v28  ;;  %v5287_v28 = vld [vmem:[%s7091_s10 + $0xb0] sm:$0xff] }
 0x6e5   : > { %v2448_v29 = vpop.xlane.xlu1 %2447 }
 0x6e6   : > { %6056 = vrcp.f32 %v2448_v29  ;;  %v5288_v29 = vld [vmem:[%s7091_s10 + $0xb8] sm:$0xff] }
 0x6e7   : > { %v6053_v30 = vpop.eup %6052 }
 0x6e8   : > { %v2473_v32 = vmul.f32 %v6053_v30, %v6037_v55  ;;  %v4198_v30 = vld [vmem:[%s7092_s11] sm:$0xff] }
 0x6e9   : > { %v2451_v41 = vpop.xlane.xlu1 %2450 }
 0x6ea   : > { %6058 = vrcp.f32 %v2451_v41 }
 0x6eb   : > { %v6055_v31 = vpop.eup %6054 }
 0x6ec   : > { %v2472_v33 = vmul.f32 %v6055_v31, %v6039_v0  ;;  %v2799_v0 = vld [vmem:[%s7091_s10 + $0x18] sm:$0xff]  ;;  %v5330_v31 = vld [vmem:[%s7092_s11 + $0x48] sm:$0xff] }
 0x6ed   : > { %v2454_v42 = vpop.xlane.xlu1 %2453  ;;  %v2457_v43 = vpop.xlane.xlu0 %2456 }
 0x6ee   : > { %6060 = vrcp.f32 %v2454_v42  ;;  %v5866_v45 = vpack.c.bf16 %v2473_v32, %v2472_v33  ;;  %v4199_v32 = vld [vmem:[%s7092_s11 + $0x8] sm:$0xff]  ;;  %v5331_v42 = vld [vmem:[%s7092_s11 + $0x50] sm:$0xff] }
 0x6ef   : > { %6062 = vrcp.f32 %v2457_v43  ;;  %v4200_v43 = vld [vmem:[%s7092_s11 + $0x10] sm:$0xff] }
 0x6f0   : > { %5868 = vmatpush3.bf16.xpose.msk.msra.mxu0 %vm6706_vm4, %v5866_v45  ;;  %v6057_v38 = vpop.eup %6056  ;;  %v5332_v45 = vld [vmem:[%s7092_s11 + $0x58] sm:$0xff] }
 0x6f1   : > { %v2460_v46 = vpop.xlane.xlu1 %2459  ;;  %5873 = vmatprep.subr.bf16.mxu0 %v6237_v26  ;;  %v2474_v48 = vmul.f32 %v6057_v38, %v6041_v5  ;;  %v2802_v5 = vld [vmem:[%s7091_s10 + $0x30] sm:$0xff] }
 0x6f2   : > { %6064 = vrcp.f32 %v2460_v46  ;;  %v4201_v46 = vld [vmem:[%s7092_s11 + $0x18] sm:$0xff] }
 0x6f4   : > { %v6059_v34 = vpop.eup %6058 }
 0x6f5   : > { %v2475_v36 = vmul.f32 %v6059_v34, %v6043_v12  ;;  %v2463_v39 = vpop.xlane.xlu0 %2462  ;;  %v5267_v12 = vld [vmem:[%s7091_s10 + $0x70] sm:$0xff]  ;;  %v4202_v34 = vld [vmem:[%s7092_s11 + $0x20] sm:$0xff] }
 0x6f6   : > { %6066 = vrcp.f32 %v2463_v39  ;;  %v4203_v39 = vld [vmem:[%s7092_s11 + $0x28] sm:$0xff] }
 0x6f7   : > { %5660 = vmatmul.mubr.msk.f32.vlgmr.msra.gmra.mrb[20].mxu0 %vm1141_vm3, %v1846_v18  ;;  %v5870_v49 = vpack.c.bf16 %v2475_v36, %v2474_v48  ;;  %v5334_v36 = vld [vmem:[%s7092_s11 + $0x68] sm:$0xff] }
 0x6f8   : > { %v6061_v40 = vpop.eup %6060  ;;  %5673 = vmatprep.mubr.msk.f32.mxu0 %vm6233_vm1, %v6232_v22 }
 0x6f9   : > { %v6063_v51 = vpop.eup %6062  ;;  %v2476_v52 = vmul.f32 %v6061_v40, %v6045_v15  ;;  %5872 = vmatpush3.bf16.xpose.msk.msra.mxu1 %vm6706_vm4, %v5870_v49  ;;  %v5268_v15 = vld [vmem:[%s7091_s10 + $0x78] sm:$0xff]  ;;  %v5335_v49 = vld [vmem:[%s7092_s11 + $0x70] sm:$0xff] }
 0x6fa   : > { %v2477_v53 = vmul.f32 %v6063_v51, %v6047_v16  ;;  %5877 = vmatprep.subr.bf16.mxu1 %v6237_v26  ;;  %v1992_v26 = vadd.f32 %v5224_v47, %v6668_v4  ;;  %v2798_v4 = vld [vmem:[%s7091_s10 + $0x10] sm:$0xff]  ;;  %v5301_v16 = vld [vmem:[%s7091_s10 + $0xc0] sm:$0xff] }
 0x6fb   : > { %v5333_v47 = vld [vmem:[%s7092_s11 + $0x60] sm:$0xff]  ;;  %v4204_v40 = vld [vmem:[%s7092_s11 + $0x30] sm:$0xff] }
 0x6fc   : > { %v5874_v63 = vpack.c.bf16 %v2477_v53, %v2476_v52  ;;  %v6065_v56 = vpop.eup %6064  ;;  %v5336_v53 = vld [vmem:[%s7092_s11 + $0x78] sm:$0xff] }
 0x6fd   : > { %v2478_v58 = vmul.f32 %v6065_v56, %v6049_v21  ;;  %v5285_v21 = vld [vmem:[%s7091_s10 + $0xa0] sm:$0xff] }
 0x6fe   : > { %5876 = vmatpush3.bf16.xpose.msk.msra.mxu0 %vm6706_vm4, %v5874_v63  ;;  %v4205_v63 = vld [vmem:[%s7092_s11 + $0x38] sm:$0xff] }
 0x6ff   : > { %5683 = vmatprep.subr.msk.mxu0 %vm796_vm2, %v6648_v35 }
 0x700   : > { %v6067_v55 = vpop.eup %6066  ;;  %5667 = vmatmul.mubr.msk.f32.vlgmr.msra.gmra.mrb[24].mxu1 %vm1141_vm3, %v1919_v54 }
 0x701   : > { %v2479_v59 = vmul.f32 %v6067_v55, %v6051_v24  ;;  %5680 = vmatprep.mubr.msk.f32.mxu1 %vm6233_vm1, %v6232_v22  ;;  %v2797_v22 = vld [vmem:[%s7091_s10 + $0x8] sm:$0xff]  ;;  %v5305_v24 = vld [vmem:[%s7091_s10 + $0xe0] sm:$0xff] }
 0x703   : > { %v5878_v60 = vpack.c.bf16 %v2479_v59, %v2478_v58 }
 0x705   : > { %5674 = vmatmul.mubr.msk.f32.vlgmr.msra.gmra.mrb[22].mxu0 %vm1141_vm3, %v1992_v26  ;;  %5880 = vmatpush3.bf16.xpose.msk.msra.mxu1 %vm6706_vm4, %v5878_v60 }
 0x706   : > { %5684 = vmatpush3.xpose.msk.msra.mxu0 %vm796_vm2, %v6648_v35  ;;  %5703 = vmatprep.subr.msk.mxu1 %vm796_vm2, %v6648_v35 }
 0x707   : > { %5688 = vmatprep.subr.msk.mxu0 %vm796_vm2, %v6655_v50  ;;  %5685 = vmatprep.mubr.msk.f32.mxu0 %vm796_vm2, %v2796_v9 }
 0x709   : > { %5686 = vmatmul.mubr.msk.f32.vlgmr.msra.gmra.mrb[24].mxu0 %vm796_vm2, %v2797_v22 }
 0x70a   : > { %5689 = vmatpush3.xpose.msk.msra.mxu0 %vm796_vm2, %v6655_v50  ;;  %5690 = vmatprep.mubr.msk.f32.mxu0 %vm796_vm2, %v2798_v4  ;;  %v4900_v4 = vld [vmem:[%s7094_s13] sm:$0xff] }
 0x70b   : > { %5693 = vmatprep.subr.msk.mxu0 %vm796_vm2, %v6650_v37 }
 0x70c   : > { %5681 = vmatmul.mubr.msk.f32.vlgmr.msra.gmra.mrb[26].mxu1 %vm1141_vm3, %v2065_v61  ;;  %v4901_v61 = vld [vmem:[%s7094_s13 + $0x8] sm:$0xff] }
 0x70d   : > { %5704 = vmatpush3.xpose.msk.msra.mxu1 %vm796_vm2, %v6648_v35  ;;  %5705 = vmatprep.mubr.msk.f32.mxu1 %vm796_vm2, %v5261_v62  ;;  %v5881_v62 = vpack.c.bf16 %v4901_v61, %v4900_v4 }
 0x70e   : > { %5708 = vmatprep.subr.msk.mxu1 %vm796_vm2, %v6655_v50 }
 0x710   : > { %5706 = vmatmul.mubr.msk.f32.vlgmr.msra.gmra.mrb[28].mxu1 %vm796_vm2, %v5262_v11  ;;  %v4902_v11 = vld [vmem:[%s7094_s13 + $0x10] sm:$0xff] }
 0x711   : > { %5691 = vmatmul.mubr.msk.f32.vlgmr.msra.gmra.mrb[24].mxu0 %vm796_vm2, %v2799_v0  ;;  %5709 = vmatpush3.xpose.msk.msra.mxu1 %vm796_vm2, %v6655_v50  ;;  %v4903_v0 = vld [vmem:[%s7094_s13 + $0x18] sm:$0xff] }
 0x712   : > { %5694 = vmatpush3.xpose.msk.msra.mxu0 %vm796_vm2, %v6650_v37  ;;  %5713 = vmatprep.subr.msk.mxu1 %vm796_vm2, %v6650_v37 }
 0x713   : > { %5698 = vmatprep.subr.msk.mxu0 %vm796_vm2, %v6657_v57  ;;  %5695 = vmatprep.mubr.msk.f32.mxu0 %vm796_vm2, %v2800_v1  ;;  %v5885_v1 = vpack.c.bf16 %v4903_v0, %v4902_v11 }
 0x714   : > { %5710 = vmatprep.mubr.msk.f32.mxu1 %vm796_vm2, %v5263_v2 }
 0x718   : > { %5711 = vmatmul.mubr.msk.f32.vlgmr.msra.gmra.mrb[28].mxu1 %vm796_vm2, %v5264_v3 }
 0x719   : > { %5696 = vmatmul.mubr.msk.f32.vlgmr.msra.gmra.mrb[24].mxu0 %vm796_vm2, %v2801_v19  ;;  %5714 = vmatpush3.xpose.msk.msra.mxu1 %vm796_vm2, %v6650_v37 }
 0x71a   : > { %5699 = vmatpush3.xpose.msk.msra.mxu0 %vm796_vm2, %v6657_v57  ;;  %5718 = vmatprep.subr.msk.mxu1 %vm796_vm2, %v6657_v57 }
 0x71b   : > { %5723 = vmatprep.subr.msk.mxu0 %vm796_vm2, %v6648_v35  ;;  %5700 = vmatprep.mubr.msk.f32.mxu0 %vm796_vm2, %v2802_v5 }
 0x71c   : > { %5715 = vmatprep.mubr.msk.f32.mxu1 %vm796_vm2, %v5265_v6  ;;  %v4896_v6 = vld [vmem:[%s7093_s12] sm:$0xff] }
 0x720   : > { %5716 = vmatmul.mubr.msk.f32.vlgmr.msra.gmra.mrb[28].mxu1 %vm796_vm2, %v5266_v7  ;;  %v4897_v7 = vld [vmem:[%s7093_s12 + $0x8] sm:$0xff] }
 0x721   : > { %5701 = vmatmul.mubr.msk.f32.vlgmr.msra.gmra.mrb[24].mxu0 %vm796_vm2, %v2803_v8  ;;  %5719 = vmatpush3.xpose.msk.msra.mxu1 %vm796_vm2, %v6657_v57  ;;  %v5889_v8 = vpack.c.bf16 %v4897_v7, %v4896_v6 }
 0x722   : > { %5724 = vmatpush3.xpose.msk.msra.mxu0 %vm796_vm2, %v6648_v35  ;;  %5743 = vmatprep.subr.msk.mxu1 %vm796_vm2, %v6648_v35 }
 0x723   : > { %5728 = vmatprep.subr.msk.mxu0 %vm796_vm2, %v6655_v50  ;;  %5725 = vmatprep.mubr.msk.f32.mxu0 %vm796_vm2, %v5281_v10 }
 0x724   : > { %5720 = vmatprep.mubr.msk.f32.mxu1 %vm796_vm2, %v5267_v12 }
 0x725   : > { %5726 = vmatmul.mubr.msk.f32.vlgmr.msra.gmra.mrb[26].mxu0 %vm796_vm2, %v5282_v13 }
 0x726   : > { %5729 = vmatpush3.xpose.msk.msra.mxu0 %vm796_vm2, %v6655_v50  ;;  %5730 = vmatprep.mubr.msk.f32.mxu0 %vm796_vm2, %v5283_v14 }
 0x727   : > { %5733 = vmatprep.subr.msk.mxu0 %vm796_vm2, %v6650_v37 }
 0x728   : > { %5721 = vmatmul.mubr.msk.f32.vlgmr.msra.gmra.mrb[28].mxu1 %vm796_vm2, %v5268_v15 }
 0x729   : > { %5744 = vmatpush3.xpose.msk.msra.mxu1 %vm796_vm2, %v6648_v35  ;;  %5745 = vmatprep.mubr.msk.f32.mxu1 %vm796_vm2, %v5301_v16  ;;  %v5303_v35 = vld [vmem:[%s7091_s10 + $0xd0] sm:$0xff] }
 0x72a   : > { %5748 = vmatprep.subr.msk.mxu1 %vm796_vm2, %v6655_v50 }
 0x72c   : > { %5746 = vmatmul.mubr.msk.f32.vlgmr.msra.gmra.mrb[30].mxu1 %vm796_vm2, %v5302_v17  ;;  %v4898_v17 = vld [vmem:[%s7093_s12 + $0x10] sm:$0xff] }
 0x72d   : > { %5731 = vmatmul.mubr.msk.f32.vlgmr.msra.gmra.mrb[26].mxu0 %vm796_vm2, %v5284_v20  ;;  %5749 = vmatpush3.xpose.msk.msra.mxu1 %vm796_vm2, %v6655_v50  ;;  %v5304_v50 = vld [vmem:[%s7091_s10 + $0xd8] sm:$0xff] }
 0x72e   : > { %5734 = vmatpush3.xpose.msk.msra.mxu0 %vm796_vm2, %v6650_v37  ;;  %5753 = vmatprep.subr.msk.mxu1 %vm796_vm2, %v6650_v37  ;;  %v4899_v20 = vld [vmem:[%s7093_s12 + $0x18] sm:$0xff] }
 0x72f   : > { %5738 = vmatprep.subr.msk.mxu0 %vm796_vm2, %v6657_v57  ;;  %5735 = vmatprep.mubr.msk.f32.mxu0 %vm796_vm2, %v5285_v21 }
 0x730   : > { %5750 = vmatprep.mubr.msk.f32.mxu1 %vm796_vm2, %v5303_v35 }
 0x734   : > { %5751 = vmatmul.mubr.msk.f32.vlgmr.msra.gmra.mrb[30].mxu1 %vm796_vm2, %v5304_v50  ;;  %v6068_v50 = vld [vmem:[%s6469_s23] sm:$0xff] }
 0x735   : > { %5736 = vmatmul.mubr.msk.f32.vlgmr.msra.gmra.mrb[26].mxu0 %vm796_vm2, %v5286_v23  ;;  %5754 = vmatpush3.xpose.msk.msra.mxu1 %vm796_vm2, %v6650_v37  ;;  %v5308_v37 = vld [vmem:[%s7091_s10 + $0xf8] sm:$0xff] }
 0x736   : > { %5739 = vmatpush3.xpose.msk.msra.mxu0 %vm796_vm2, %v6657_v57  ;;  %5758 = vmatprep.subr.msk.mxu1 %vm796_vm2, %v6657_v57 }
 0x737   : > { %5755 = vmatprep.mubr.msk.f32.mxu1 %vm796_vm2, %v5305_v24  ;;  %5740 = vmatprep.mubr.msk.f32.mxu0 %vm796_vm2, %v5287_v28  ;;  %v6069_v24 = vld [vmem:[%s6469_s23 + $0x8] sm:$0xff]  ;;  %s525_s23 = sand.u32 1, %s7133_s30   ;;  %s6160_s30 = scalar_lea.vmem %s6159_s26, 512 }
 0x738   : > { %s5194_s29 = sshll.u32 %s525_s23, 4  ;;  %s7039_s8 = scalar_lea.sflag [#allocation6], %s525_s23 }
 0x739   : > { %s527_s16 = scalar_lea.vmem [#allocation10], %s5194_s29 }
 0x73c   : > { %5756 = vmatmul.mubr.msk.f32.vlgmr.msra.gmra.mrb[30].mxu1 %vm796_vm2, %v5306_v25 }
 0x73d   : > { %5759 = vmatpush3.xpose.msk.msra.mxu1 %vm796_vm2, %v6657_v57  ;;  %5760 = vmatprep.mubr.msk.f32.mxu1 %vm796_vm2, %v5307_v27  ;;  %v5329_v57 = vld [vmem:[%s7092_s11 + $0x40] sm:$0xff]  ;;  %v5893_v27 = vpack.c.bf16 %v4899_v20, %v4898_v17 }
 0x73e   : > { %5741 = vmatmul.mubr.msk.f32.vlgmr.msra.gmra.mrb[26].mxu0 %vm796_vm2, %v5288_v29 }
 0x73f   : > { %5765 = vmatprep.mubr.msk.f32.mxu0 %vm1141_vm3, %v4198_v30 }
 0x744   : > { %5761 = vmatmul.mubr.msk.f32.vlgmr.msra.gmra.mrb[30].mxu1 %vm796_vm2, %v5308_v37 }
 0x745   : > { %5785 = vmatprep.mubr.msk.f32.mxu1 %vm1141_vm3, %v5329_v57 }
 0x7ca   : > { %v2555_v41 = vpop.f32.mrb[20].mxu0 }
 0x7cb   : > { %v5661_v33 = vpop.f32.mrb[21].mxu0  ;;  %5763 = vmatprep.subr.mxu0 %v2555_v41  ;;  %5783 = vmatprep.subr.mxu1 %v2555_v41 }
 0x7cc   : > { %5764 = vmatpush3.msra.mxu0 %v2555_v41  ;;  %5784 = vmatpush3.msra.mxu1 %v2555_v41  ;;  %v5349_v41 = vld [vmem:[#allocation9] ss:$0 sm:$0xff] }
 0x7cd   : > { %5786 = vmatmul.mubr.msk.f32.vlgmr.msra.gmra.mrb[32].mxu1 %vm1141_vm3, %v5330_v31  ;;  %5766 = vmatmul.mubr.msk.f32.vlgmr.msra.gmra.mrb[28].mxu0 %vm1141_vm3, %v4199_v32 }
 0x7ce   : > { %5790 = vmatprep.mubr.msk.f32.mxu1 %vm1141_vm3, %v5331_v42  ;;  %5770 = vmatprep.mubr.msk.f32.mxu0 %vm1141_vm3, %v4200_v43 }
 0x7d3   : > { %v2634_v44 = vpop.f32.mrb[24].mxu1 }
 0x7d4   : > { %v5668_v38 = vpop.f32.mrb[25].mxu1  ;;  %5768 = vmatprep.subr.mxu0 %v2634_v44  ;;  %5788 = vmatprep.subr.mxu1 %v2634_v44 }
 0x7d5   : > { %5769 = vmatpush3.msra.mxu0 %v2634_v44  ;;  %5789 = vmatpush3.msra.mxu1 %v2634_v44 }
 0x7d6   : > { %5791 = vmatmul.mubr.msk.f32.vlgmr.msra.gmra.mrb[32].mxu1 %vm1141_vm3, %v5332_v45  ;;  %5771 = vmatmul.mubr.msk.f32.vlgmr.msra.gmra.mrb[28].mxu0 %vm1141_vm3, %v4201_v46 }
 0x7d7   : > { %5795 = vmatprep.mubr.msk.f32.mxu1 %vm1141_vm3, %v5333_v47  ;;  %5775 = vmatprep.mubr.msk.f32.mxu0 %vm1141_vm3, %v4202_v34 }
 0x7d8   : > { %v2713_v18 = vpop.f32.mrb[22].mxu0 }
 0x7d9   : > { %v5675_v48 = vpop.f32.mrb[23].mxu0  ;;  %5773 = vmatprep.subr.mxu0 %v2713_v18  ;;  %5793 = vmatprep.subr.mxu1 %v2713_v18 }
 0x7da   : > { %5774 = vmatpush3.msra.mxu0 %v2713_v18  ;;  %5794 = vmatpush3.msra.mxu1 %v2713_v18 }
 0x7de   : > { %5796 = vmatmul.mubr.msk.f32.vlgmr.msra.gmra.mrb[32].mxu1 %vm1141_vm3, %v5334_v36  ;;  %5776 = vmatmul.mubr.msk.f32.vlgmr.msra.gmra.mrb[28].mxu0 %vm1141_vm3, %v4203_v39 }
 0x7df   : > { %v2792_v51 = vpop.f32.mrb[26].mxu1  ;;  %5800 = vmatprep.mubr.msk.f32.mxu1 %vm1141_vm3, %v5335_v49  ;;  %5780 = vmatprep.mubr.msk.f32.mxu0 %vm1141_vm3, %v4204_v40 }
 0x7e0   : > { %v5682_v52 = vpop.f32.mrb[27].mxu1  ;;  %5778 = vmatprep.subr.mxu0 %v2792_v51  ;;  %5798 = vmatprep.subr.mxu1 %v2792_v51 }
 0x7e1   : > { %5779 = vmatpush3.msra.mxu0 %v2792_v51  ;;  %5799 = vmatpush3.msra.mxu1 %v2792_v51 }
 0x7e2   : > { %5882 = vmatprep.subr.bf16.mxu0 %v5881_v62 }
 0x7e6   : > { %5801 = vmatmul.mubr.msk.f32.vlgmr.msra.gmra.mrb[32].mxu1 %vm1141_vm3, %v5336_v53  ;;  %5781 = vmatmul.mubr.msk.f32.vlgmr.msra.gmra.mrb[28].mxu0 %vm1141_vm3, %v4205_v63 }
 0x7e7   : > { %5884 = vmatpush3.bf16.msra.mxu0 %v5881_v62 }
 0x7e8   : > { %5886 = vmatprep.subr.bf16.mxu0 %v5885_v1 }
 0x7eb   : > { %5888 = vmatpush3.bf16.msra.mxu0 %v5885_v1 }
 0x7ec   : > { %5890 = vmatprep.subr.bf16.mxu0 %v5889_v8 }
 0x7f4   : > { %v5702_v56 = vpop.f32.mrb[24].mxu0 }
 0x7f5   : > { %3147 = vst.msk [vmem:[#allocation2 + $0x8] sm:$0xff] %vm1141_vm3, %v5702_v56  ;;  %v3131_v54 = vpop.f32.mrb[25].mxu0 }
 0x7f6   : > { %3146 = vst.msk [vmem:[#allocation2] sm:$0xff] %vm1141_vm3, %v3131_v54 }
 0x7fb   : > { %v5722_v55 = vpop.f32.mrb[28].mxu1 }
 0x7fc   : > { %v3472_v58 = vpop.f32.mrb[29].mxu1 }
 0x7fd   : > { %3489 = vrot.lane.b32.xlu1 %v3472_v58, %s6238_s19 }
 0x811   : > { %v5742_v60 = vpop.f32.mrb[26].mxu0 }
 0x812   : > { %v3822_v9 = vpop.f32.mrb[27].mxu0 }
 0x817   : > { %v5762_v59 = vpop.f32.mrb[30].mxu1 }
 0x818   : > { %v4172_v26 = vpop.f32.mrb[31].mxu1 }
 0x86f   : > { %v3490_v22 = vpop.permute.xlu1 %3489 }
 0x870   : > { %3496 = vst.msk [vmem:[#allocation2] sm:$0xff] %vm3495_vm5, %v3490_v22 }
 0x8b9   : > { %v5802_v2 = vpop.f32.mrb[32].mxu1  ;;  %v5782_v3 = vpop.f32.mrb[28].mxu0 }
 0x8ba   : > { %4881 = vrot.lane.b32.xlu0 %v5802_v2, %s6239_s27  ;;  %v4862_v19 = vpop.f32.mrb[33].mxu1  ;;  %4537 = vst.msk [vmem:[#allocation3 + $0x8] sm:$0xff] %vm796_vm2, %v5782_v3  ;;  %v4521_v5 = vpop.f32.mrb[29].mxu0 }
 0x8bb   : > { %4879 = vrot.lane.b32.xlu1 %v4862_v19, %s6239_s27  ;;  %4536 = vst.msk [vmem:[#allocation3] sm:$0xff] %vm796_vm2, %v4521_v5 }
 0x8be   : > { %3839 = vrot.lane.b32.xlu0 %v3822_v9, %s6239_s27 }
 0x8bf   : > { %3491 = vrot.lane.b32.xlu1 %v5722_v55, %s6238_s19 }
 0x8c2   : > { %4189 = vrot.lane.b32.xlu0 %v4172_v26, %s6240_s25 }
 0x8c3   : > { %3841 = vrot.lane.b32.xlu1 %v5742_v60, %s6239_s27  ;;  %s5091_s27 = sshll.u32 %s527_s16, 4  ;;  %s7030_s27 = int_to_ptr.vmem [resolvable:$true] %s5091_s27 }
 0x8c4   : > { %s6154_s22 = scalar_lea.vmem %s7030_s27, 256  ;;  %p6161_p4 = scmp.lt.s32.totalorder %s7030_s27, %s6159_s26 }
 0x8c5   : > { %p6155_p12 = scmp.ne.s32.totalorder %s7030_s27, %s6154_s22  ;;  %p6162_p7 = scmp.lt.s32.totalorder %s6160_s30, %s6154_s22 }
 0x8c7   : > { %4191 = vrot.lane.b32.xlu1 %v5762_v59, %s6240_s25  ;;  %s7136_s25 = smov %s7135_s21  ;;  %p6156_p2 = pnand %p6155_p12, %p7137_p10 }
 0x8c8   : > { %p6163_p8 = por %p6162_p7, %p6161_p4 }
 0x8c9   : > { %p6157_p3 = pneg %p6156_p2 }
 0x8cb   : > { %p6164_p11 = pnand %p6163_p8, %p6157_p3 }
 0x92c   : > { %v4882_v10 = vpop.permute.xlu0 %4881 }
 0x92d   : > { %4887 = vst.msk [vmem:[#allocation3 + $0x8] sm:$0xff] %vm4885_vm6, %v4882_v10  ;;  %v4880_v12 = vpop.permute.xlu1 %4879 }
 0x92e   : > { %4886 = vst.msk [vmem:[#allocation3] sm:$0xff] %vm4885_vm6, %v4880_v12 }
 0x930   : > { %v3840_v13 = vpop.permute.xlu0 %3839 }
 0x931   : > { %3846 = vst.msk [vmem:[#allocation2] sm:$0xff] %vm3845_vm7, %v3840_v13  ;;  %v3492_v14 = vpop.permute.xlu1 %3491 }
 0x932   : > { %3497 = vst.msk [vmem:[#allocation2 + $0x8] sm:$0xff] %vm3495_vm5, %v3492_v14 }
 0x934   : > { %v4190_v15 = vpop.permute.xlu0 %4189  ;;  %v4893_v16 = vld [vmem:[#allocation3 + $0x8] sm:$0xff] }
 0x935   : > { %4196 = vst.msk [vmem:[#allocation2] sm:$0xff] %vm4195_vm8, %v4190_v15  ;;  %v3842_v21 = vpop.permute.xlu1 %3841  ;;  %v4892_v35 = vld [vmem:[#allocation3] sm:$0xff]  ;;  %v4895_v25 = vadd.f32 %v6069_v24, %v4893_v16 }
 0x936   : > { %3847 = vst.msk [vmem:[#allocation2 + $0x8] sm:$0xff] %vm3845_vm7, %v3842_v21  ;;  %v4894_v23 = vadd.f32 %v6068_v50, %v4892_v35 }
 0x938   : > { %5811 = vmatprep.mubr.msk.f32.mxu0 %vm546_vm0, %v4894_v23 }
 0x939   : > { %5812 = vmatmul.mubr.msk.f32.vlgmr.msra.gmra.mrb[30].mxu0 %vm546_vm0, %v4895_v25  ;;  %v4192_v37 = vpop.permute.xlu1 %4191 }
 0x93a   : > { %4197 = vst.msk [vmem:[#allocation2 + $0x8] sm:$0xff] %vm4195_vm8, %v4192_v37  ;;  %5892 = vmatpush3.bf16.msra.mxu0 %v5889_v8 }
 0x93b   : > { %5894 = vmatprep.subr.bf16.mxu0 %v5893_v27 }
 0x93c   : > { %v4888_v28 = vld [vmem:[#allocation2] sm:$0xff] }
 0x93d   : > { %v4890_v29 = vadd.f32 %v6068_v50, %v4888_v28 }
 0x93e   : > { %5896 = vmatpush3.bf16.msra.mxu0 %v5893_v27 }
 0x93f   : > { %5822 = vmatprep.mubr.msk.f32.mxu0 %vm546_vm0, %v4890_v29 }
 0x941   : > { %v4889_v57 = vld [vmem:[#allocation2 + $0x8] sm:$0xff] }
 0x942   : > { %v4891_v30 = vadd.f32 %v6069_v24, %v4889_v57 }
 0x944   : > { %5823 = vmatmul.mubr.msk.f32.vlgmr.msra.gmra.mrb[30].mxu0 %vm546_vm0, %v4891_v30 }
 0xa17   : > { %v5824_v31 = vpop.f32.mrb[30].mxu0 }
 0xa18   : > { %v5074_v32 = vadd.f32 %v5824_v31, %v5349_v41  ;;  %v5057_v33 = vpop.f32.mrb[31].mxu0 }
 0xa19   : > { %v5073_v42 = vadd.f32 %v5349_v41, %v5057_v33 }
 0xa1a   : > { %5076 = vst.msk [vmem:[%s527_s16 + $0x8] sm:$0xff] %vm546_vm0, %v5074_v32 }
 0xa1b   : > { %5075 = vst.msk [vmem:[%s527_s16] sm:$0xff] %vm546_vm0, %v5073_v42 }
 0xa1c   : > { %6167 = shalt.err (!%p6164_p11)
}
 0xa1d   : > { %s6168_s23 = scalar_lea.hbm %s7035_s28, 256  ;;  %s6172_s24 = scalar_lea.hbm %s7136_s25, 512 }
 0xa1e   : > { %p6169_p13 = scmp.ne.s32.totalorder %s7035_s28, %s6168_s23  ;;  %p6173_p6 = scmp.lt.u32.totalorder %s7035_s28, %s7136_s25 }
 0xa1f   : > { %p6174_p5 = scmp.lt.u32.totalorder %s6172_s24, %s6168_s23  ;;  %p6176_p12 = scmp.lt.u32.totalorder %s6168_s23, %s7035_s28 }
 0xa20   : > { %p6170_p1 = pnand %p6169_p13, %p7137_p10 }
 0xa21   : > { %p6175_p9 = por %p6174_p5, %p6173_p6 }
 0xa22   : > { %p6171_p0 = pneg %p6170_p1 }
 0xa23   : > { %p6177_p2 = por %p6176_p12, %p6175_p9 }
 0xa25   : > { %p6178_p3 = pnand %p6177_p2, %p6171_p0 }
 0xa27   : > { %6181 = shalt.err (!%p6178_p3)
}
 0xa28   : > { %s6242_s21 = smov 128  }
 0xa29   : > { %5947 = dma.vmem_to_hbm [thread:$0]  (%p7137_p10), %s7030_s27, 256, %s7035_s28, %s7039_s8, %s6242_s21, %s6242_s21, %s6238_s19  }
 0xa2a PF: > { %s7138_s22 = sld [smem:[#allocation17_spill]]  ;;  %s7139_s20 = sld [smem:[#allocation14_spill]] }
 0xa2b   : > { %s7140_s26 = sld [smem:[#allocation21_spill]] }
 0xa30   : > { %p5969_p4 = scmp.ge.s32.totalorder %s7138_s22, 2  ;;  %s5106_s30 = sand.u32 1, %s7139_s20  }
 0xa31   : > { %p7141_p7 = scmp.ne.s32.totalorder %s7140_s26, 0  ;;  %s5107_s23 = scalar_lea.sflag [#allocation6], %s5106_s30 }
 0xa33   : > { %p5960_p8 = pnand %p5969_p4, %p7141_p7 }
 0xa35   : > { %6207 = dma.done.wait (!%p5960_p8), %s5107_s23, 256  }
 0xa36   : > { %6209 = vsyncadd (!%p5960_p8), %s5107_s23, 4294967040  ;;  %s7142_s21 = sld [smem:[#allocation18_spill]]  ;;  %s7143_s18 = sld [smem:[#allocation15_spill]] }
 0xa37   : > { %s7144_s19 = sld [smem:[#allocation16_spill]]  ;;  %s7145_s20 = sld [smem:[#allocation19_spill]] }
 0xa3c   : > { %p27_p11 = scmp.ge.s32.totalorder %s7142_s21, 4  }
 0xa3e   :  { %29 = sbr.rel (!%p27_p11) target bundleno = 8 (0x8), region = 132 }
 0xa45   :  { %5112 = vsyncpa [#allocation5], 1 }
 0xa46   :  { %5114 = vsyncpa [#allocation5 + $0x1], 1 }
 0xa47   :  { %5115 = vsyncpa [#allocation8], 1 }
 0xa48   :  { %5116 = vsyncpa [#allocation6], 1 }
 0xa49   :  { %5118 = vsyncpa [#allocation6 + $0x1], 1 }

</bundles_post_ra>
